<compile_context>
chip_gen: v6e
topology: v6e:2x2x1
jax: 0.10.0
libtpu: 0.0.40
codegen_flags: <defaults>
</compile_context>

<pallas_src>
import functools

import jax
import jax.numpy as jnp
from jax import lax
from jax.experimental import pallas as pl
from jax.experimental.pallas import tpu as pltpu

KSIZE = 7
PAD = (KSIZE - 1) // 2


def spatial_attention_kernel(w_ref, row_ref, col_ref, x_ref, o_ref, *,
                             H, W, c_chunk, mul_bf16):
    # w_ref   : SMEM f32[2*7*7]  flattened conv weight (out=1, in=[avg,max],7,7)
    # row_ref : VMEM i32[1, H*W] row index of each flattened pixel
    # col_ref : VMEM i32[1, H*W] col index of each flattened pixel
    # x_ref   : VMEM (Bt, C, H*W) lane-dense input block
    # o_ref   : VMEM (Bt, C, H*W) lane-dense output block
    Bt, C, HW = x_ref.shape
    n_full = C // c_chunk
    rem = C - n_full * c_chunk
    mul_dtype = jnp.bfloat16 if mul_bf16 else jnp.float32

    # ---- boundary masks: hoisted, computed once per grid step, Bt-wide -----
    rows = jnp.broadcast_to(row_ref[...], (Bt, HW))
    cols = jnp.broadcast_to(col_ref[...], (Bt, HW))
    row_masks, col_masks = [], []
    for k in range(KSIZE):
        d = k - PAD
        row_masks.append(jnp.logical_and(rows + d >= 0, rows + d < H))
        col_masks.append(jnp.logical_and(cols + d >= 0, cols + d < W))

    # ---- channel mean / max, streamed over C with chunk-wide carries -------
    def red_body(ci, carry):
        s, m = carry
        start = pl.multiple_of(ci * c_chunk, c_chunk)
        xc = x_ref[:, pl.ds(start, c_chunk), :].astype(jnp.float32)
        return s + xc, jnp.maximum(m, xc)            # pure VALU per chunk

    s0 = jnp.zeros((Bt, c_chunk, HW), jnp.float32)
    m0 = jnp.full((Bt, c_chunk, HW), -jnp.inf, jnp.float32)
    unroll_r = n_full if n_full <= 8 else 4
    s_c, m_c = lax.fori_loop(0, n_full, red_body, (s0, m0), unroll=unroll_r)
    s = jnp.sum(s_c, axis=1)                         # one cross-sublane reduce
    mx = jnp.max(m_c, axis=1)
    if rem:
        xr = x_ref[:, pl.ds(n_full * c_chunk, rem), :].astype(jnp.float32)
        s = s + jnp.sum(xr, axis=1)
        mx = jnp.maximum(mx, jnp.max(xr, axis=1))
    avg = s * (1.0 / C)                              # (Bt, HW) f32

    # ---- 7x7 zero-padded conv over [avg, max] in flat (Bt, HW) layout -------
    # ky-outer: one row roll+mask per ky for avg and max, accumulate into 7
    # per-kx accumulators, apply the col roll + mask once per kx at the end.
    accs = [jnp.zeros((Bt, HW), jnp.float32) for _ in range(KSIZE)]
    for ky in range(KSIZE):
        dy = ky - PAD
        sh = (-dy * W) % HW
        a = avg if sh == 0 else pltpu.roll(avg, shift=sh, axis=1)
        m = mx if sh == 0 else pltpu.roll(mx, shift=sh, axis=1)
        a = jnp.where(row_masks[ky], a, 0.0)
        m = jnp.where(row_masks[ky], m, 0.0)
        for kx in range(KSIZE):
            w_a = w_ref[ky * KSIZE + kx]                   # avg channel tap
            w_m = w_ref[KSIZE * KSIZE + ky * KSIZE + kx]   # max channel tap
            accs[kx] = accs[kx] + w_a * a + w_m * m

    conv = jnp.zeros((Bt, HW), jnp.float32)
    for kx in range(KSIZE):
        dx = kx - PAD
        sh = (-dx) % HW
        rolled = accs[kx] if sh == 0 else pltpu.roll(accs[kx], shift=sh, axis=1)
        conv = conv + jnp.where(col_masks[kx], rolled, 0.0)

    att = jax.nn.sigmoid(conv)                       # (Bt, HW) f32

    # ---- x * att, streamed over C, lane-dense stores ------------------------
    scale = att.astype(mul_dtype)
    # Hoisted sublane broadcast (JAX does not CSE broadcast_in_dim).
    scale_b = jnp.broadcast_to(scale[:, None, :], (Bt, c_chunk, HW))

    def mul_body(ci, carry):
        start = pl.multiple_of(ci * c_chunk, c_chunk)
        xc = x_ref[:, pl.ds(start, c_chunk), :].astype(mul_dtype)
        o_ref[:, pl.ds(start, c_chunk), :] = (xc * scale_b).astype(o_ref.dtype)
        return carry

    unroll_m = n_full if n_full <= 8 else 4
    lax.fori_loop(0, n_full, mul_body, 0, unroll=unroll_m)
    if rem:
        xr = x_ref[:, pl.ds(n_full * c_chunk, rem), :].astype(mul_dtype)
        o_ref[:, pl.ds(n_full * c_chunk, rem), :] = (
            xr * scale_b[:, :rem, :]).astype(o_ref.dtype)


def _largest_divisor_leq(n, cap):
    cap = int(max(1, min(n, cap)))
    for d in range(cap, 0, -1):
        if n % d == 0:
            return d
    return 1


def _tpu_generation():
    try:
        kind = jax.devices()[0].device_kind.lower()
    except Exception:
        return "unknown"
    if "v7" in kind or "7x" in kind:
        return "v7"
    if "v6" in kind:
        return "v6"
    if "v5" in kind:
        return "v5"
    return "unknown"


def spatial_attention(x, conv_weight):
    """x: (B, C, H, W); conv_weight: (1, 2, 7, 7), no bias."""
    B, C, H, W = x.shape
    HW = H * W
    itemsize = jnp.dtype(x.dtype).itemsize

    gen = _tpu_generation()

    # bf16 streaming multiply only where the VPU has native bf16 (v6e / v7x);
    # v5e (and unknown) widen bf16 anyway, so keep f32 there.
    mul_bf16 = bool(x.dtype == jnp.bfloat16 and gen in ("v6", "v7"))
    mul_itemsize = 2 if mul_bf16 else 4

    # Channel-streaming chunk: sublane-full slabs (>= 8 rows f32 / 16 bf16),
    # ~512 KiB per slab, never driven to 1 by large HW.
    floor_c = 16 if x.dtype == jnp.bfloat16 else 8
    slab_cap = max(floor_c, (512 * 1024) // (HW * 4))
    c_chunk = int(min(C, min(slab_cap, 128)))

    # Generation-aware VMEM budgets (footprint = double-buffered in/out blocks
    # + in-kernel temporaries).  v5e/v6e: 128 MiB physical VMEM; v7x: 64 MiB.
    if gen == "v7":
        block_budget, vmem_cap = 40 << 20, 56 << 20
    elif gen == "v6":
        block_budget, vmem_cap = 80 << 20, 100 << 20
    elif gen == "v5":
        block_budget, vmem_cap = 64 << 20, 96 << 20
    else:
        block_budget, vmem_cap = 40 << 20, 56 << 20   # conservative default

    def footprint(bt):
        io = 4 * bt * C * HW * itemsize                      # 2x in + 2x out
        scratch = bt * HW * 4 * (2 * c_chunk + 28)           # carries + conv temps/masks
        scratch += bt * c_chunk * HW * mul_itemsize          # hoisted scale broadcast
        scratch += 4 * 2 * HW * 4                            # row/col id blocks
        return io + scratch

    # Keep >= 4 grid steps when B allows (>= 2 for small B) so the DMA
    # pipeline overlaps and both v7x TensorCores get "parallel" work.
    steps_target = 4 if B >= 4 else (2 if B >= 2 else 1)
    bt_steps_cap = max(1, B // steps_target)
    bt_budget = 1
    for cand in range(1, B + 1):
        if footprint(cand) <= block_budget:
            bt_budget = cand
        else:
            break
    bt = _largest_divisor_leq(B, min(bt_steps_cap, bt_budget))
    # TODO(synk): when B == 1 the grid has a single step, so one v7x TensorCore
    # idles; a halo'd HW split (or C split with map recompute) would fix this.

    vmem_limit = int(min(vmem_cap, max(32 << 20, footprint(bt) + (8 << 20))))

    w_flat = conv_weight.reshape(-1).astype(jnp.float32)     # (2*7*7,)
    x_flat = x.reshape(B, C, HW)                             # lane-dense layout

    lin = jnp.arange(HW, dtype=jnp.int32)
    row_ids = (lin // W).reshape(1, HW)
    col_ids = (lin % W).reshape(1, HW)

    kernel = functools.partial(spatial_attention_kernel, H=H, W=W,
                               c_chunk=c_chunk, mul_bf16=mul_bf16)

    out_flat = pl.pallas_call(
        kernel,
        out_shape=jax.ShapeDtypeStruct((B, C, HW), x.dtype),
        grid=(B // bt,),
        in_specs=[
            pl.BlockSpec(memory_space=pltpu.MemorySpace.SMEM),      # weights
            pl.BlockSpec((1, HW), lambda i: (0, 0)),                # row ids
            pl.BlockSpec((1, HW), lambda i: (0, 0)),                # col ids
            pl.BlockSpec((bt, C, HW), lambda i: (i, 0, 0)),         # x (flat)
        ],
        out_specs=pl.BlockSpec((bt, C, HW), lambda i: (i, 0, 0)),
        compiler_params=pltpu.CompilerParams(
            dimension_semantics=("parallel",),
            vmem_limit_bytes=vmem_limit,
        ),
    )(w_flat, row_ids, col_ids, x_flat)

    return out_flat.reshape(B, C, H, W)


def spatial_attention_ref(x, conv_weight):
    """Pure-JAX reference matching the PyTorch forward."""
    avg = jnp.mean(x, axis=1, keepdims=True)
    mx = jnp.max(x, axis=1, keepdims=True)
    att_in = jnp.concatenate([avg, mx], axis=1)              # (B, 2, H, W)
    conv = jax.lax.conv_general_dilated(
        att_in, conv_weight,
        window_strides=(1, 1), padding=[(PAD, PAD), (PAD, PAD)],
        dimension_numbers=("NCHW", "OIHW", "NCHW"))
    att = jax.nn.sigmoid(conv)
    return x * att


if __name__ == "__main__":
    key = jax.random.PRNGKey(0)
    k_x, k_w = jax.random.split(key)

    B, C, H, W = 2, 4, 16, 16
    x = jax.random.normal(k_x, (B, C, H, W), dtype=jnp.float32)
    # Deterministic weight init (kaiming-ish scale for fan_in = 2*7*7).
    conv_weight = (jax.random.normal(k_w, (1, 2, KSIZE, KSIZE), dtype=jnp.float32)
                   * (2.0 / (2 * KSIZE * KSIZE)) ** 0.5)

    out = spatial_attention(x, conv_weight)
    out = jax.block_until_ready(out)

    ref = spatial_attention_ref(x, conv_weight)
    assert out.shape == (B, C, H, W)
    assert jnp.allclose(out, ref, atol=1e-4, rtol=1e-4), "mismatch vs reference"

    print("KERNEL_OK")
</pallas_src>

<mosaic_0001>
module attributes {stable_mosaic.version = 11 : i64} {
  func.func @spatial_attention_kernel(%arg0: i32, %arg1: memref<98xf32, #tpu.memory_space<smem>>, %arg2: memref<1x256xi32, #tpu.memory_space<vmem>>, %arg3: memref<1x256xi32, #tpu.memory_space<vmem>>, %arg4: memref<1x4x256xf32, #tpu.memory_space<vmem>>, %arg5: memref<1x4x256xf32, #tpu.memory_space<vmem>>) attributes {dimension_semantics = [#tpu.dimension_semantics<parallel>], iteration_bounds = array<i64: 2>, scalar_prefetch = 0 : i64, scratch_operands = 0 : i64, tpu.core_type = #tpu.core_type<tc>, window_params = [{transform_indices = @transform_0, window_bounds = array<i64: 98>}, {pipeline_mode = #tpu.pipeline_mode<synchronous>, transform_indices = @transform_1, window_bounds = array<i64: 1, 256>}, {pipeline_mode = #tpu.pipeline_mode<synchronous>, transform_indices = @transform_2, window_bounds = array<i64: 1, 256>}, {transform_indices = @transform_3, window_bounds = array<i64: 1, 4, 256>}, {transform_indices = @transform_4, window_bounds = array<i64: 1, 4, 256>}]} {
    %c0 = arith.constant 0 : index
    %c0_0 = arith.constant 0 : index
    %0 = vector.load %arg2[%c0, %c0_0] : memref<1x256xi32, #tpu.memory_space<vmem>>, vector<1x256xi32>
    %c0_1 = arith.constant 0 : index
    %c0_2 = arith.constant 0 : index
    %1 = vector.load %arg3[%c0_1, %c0_2] : memref<1x256xi32, #tpu.memory_space<vmem>>, vector<1x256xi32>
    %c-3_i32 = arith.constant -3 : i32
    %2 = vector.broadcast %c-3_i32 : i32 to vector<1x256xi32>
    %3 = arith.addi %0, %2 : vector<1x256xi32>
    %c0_i32 = arith.constant 0 : i32
    %4 = vector.broadcast %c0_i32 : i32 to vector<1x256xi32>
    %5 = arith.cmpi sge, %3, %4 : vector<1x256xi32>
    %c-3_i32_3 = arith.constant -3 : i32
    %6 = vector.broadcast %c-3_i32_3 : i32 to vector<1x256xi32>
    %7 = arith.addi %0, %6 : vector<1x256xi32>
    %c16_i32 = arith.constant 16 : i32
    %8 = vector.broadcast %c16_i32 : i32 to vector<1x256xi32>
    %9 = arith.cmpi slt, %7, %8 : vector<1x256xi32>
    %10 = arith.andi %5, %9 : vector<1x256xi1>
    %c-3_i32_4 = arith.constant -3 : i32
    %11 = vector.broadcast %c-3_i32_4 : i32 to vector<1x256xi32>
    %12 = arith.addi %1, %11 : vector<1x256xi32>
    %c0_i32_5 = arith.constant 0 : i32
    %13 = vector.broadcast %c0_i32_5 : i32 to vector<1x256xi32>
    %14 = arith.cmpi sge, %12, %13 : vector<1x256xi32>
    %c-3_i32_6 = arith.constant -3 : i32
    %15 = vector.broadcast %c-3_i32_6 : i32 to vector<1x256xi32>
    %16 = arith.addi %1, %15 : vector<1x256xi32>
    %c16_i32_7 = arith.constant 16 : i32
    %17 = vector.broadcast %c16_i32_7 : i32 to vector<1x256xi32>
    %18 = arith.cmpi slt, %16, %17 : vector<1x256xi32>
    %19 = arith.andi %14, %18 : vector<1x256xi1>
    %c-2_i32 = arith.constant -2 : i32
    %20 = vector.broadcast %c-2_i32 : i32 to vector<1x256xi32>
    %21 = arith.addi %0, %20 : vector<1x256xi32>
    %c0_i32_8 = arith.constant 0 : i32
    %22 = vector.broadcast %c0_i32_8 : i32 to vector<1x256xi32>
    %23 = arith.cmpi sge, %21, %22 : vector<1x256xi32>
    %c-2_i32_9 = arith.constant -2 : i32
    %24 = vector.broadcast %c-2_i32_9 : i32 to vector<1x256xi32>
    %25 = arith.addi %0, %24 : vector<1x256xi32>
    %c16_i32_10 = arith.constant 16 : i32
    %26 = vector.broadcast %c16_i32_10 : i32 to vector<1x256xi32>
    %27 = arith.cmpi slt, %25, %26 : vector<1x256xi32>
    %28 = arith.andi %23, %27 : vector<1x256xi1>
    %c-2_i32_11 = arith.constant -2 : i32
    %29 = vector.broadcast %c-2_i32_11 : i32 to vector<1x256xi32>
    %30 = arith.addi %1, %29 : vector<1x256xi32>
    %c0_i32_12 = arith.constant 0 : i32
    %31 = vector.broadcast %c0_i32_12 : i32 to vector<1x256xi32>
    %32 = arith.cmpi sge, %30, %31 : vector<1x256xi32>
    %c-2_i32_13 = arith.constant -2 : i32
    %33 = vector.broadcast %c-2_i32_13 : i32 to vector<1x256xi32>
    %34 = arith.addi %1, %33 : vector<1x256xi32>
    %c16_i32_14 = arith.constant 16 : i32
    %35 = vector.broadcast %c16_i32_14 : i32 to vector<1x256xi32>
    %36 = arith.cmpi slt, %34, %35 : vector<1x256xi32>
    %37 = arith.andi %32, %36 : vector<1x256xi1>
    %c-1_i32 = arith.constant -1 : i32
    %38 = vector.broadcast %c-1_i32 : i32 to vector<1x256xi32>
    %39 = arith.addi %0, %38 : vector<1x256xi32>
    %c0_i32_15 = arith.constant 0 : i32
    %40 = vector.broadcast %c0_i32_15 : i32 to vector<1x256xi32>
    %41 = arith.cmpi sge, %39, %40 : vector<1x256xi32>
    %c-1_i32_16 = arith.constant -1 : i32
    %42 = vector.broadcast %c-1_i32_16 : i32 to vector<1x256xi32>
    %43 = arith.addi %0, %42 : vector<1x256xi32>
    %c16_i32_17 = arith.constant 16 : i32
    %44 = vector.broadcast %c16_i32_17 : i32 to vector<1x256xi32>
    %45 = arith.cmpi slt, %43, %44 : vector<1x256xi32>
    %46 = arith.andi %41, %45 : vector<1x256xi1>
    %c-1_i32_18 = arith.constant -1 : i32
    %47 = vector.broadcast %c-1_i32_18 : i32 to vector<1x256xi32>
    %48 = arith.addi %1, %47 : vector<1x256xi32>
    %c0_i32_19 = arith.constant 0 : i32
    %49 = vector.broadcast %c0_i32_19 : i32 to vector<1x256xi32>
    %50 = arith.cmpi sge, %48, %49 : vector<1x256xi32>
    %c-1_i32_20 = arith.constant -1 : i32
    %51 = vector.broadcast %c-1_i32_20 : i32 to vector<1x256xi32>
    %52 = arith.addi %1, %51 : vector<1x256xi32>
    %c16_i32_21 = arith.constant 16 : i32
    %53 = vector.broadcast %c16_i32_21 : i32 to vector<1x256xi32>
    %54 = arith.cmpi slt, %52, %53 : vector<1x256xi32>
    %55 = arith.andi %50, %54 : vector<1x256xi1>
    %c0_i32_22 = arith.constant 0 : i32
    %56 = vector.broadcast %c0_i32_22 : i32 to vector<1x256xi32>
    %57 = arith.addi %0, %56 : vector<1x256xi32>
    %c0_i32_23 = arith.constant 0 : i32
    %58 = vector.broadcast %c0_i32_23 : i32 to vector<1x256xi32>
    %59 = arith.cmpi sge, %57, %58 : vector<1x256xi32>
    %c0_i32_24 = arith.constant 0 : i32
    %60 = vector.broadcast %c0_i32_24 : i32 to vector<1x256xi32>
    %61 = arith.addi %0, %60 : vector<1x256xi32>
    %c16_i32_25 = arith.constant 16 : i32
    %62 = vector.broadcast %c16_i32_25 : i32 to vector<1x256xi32>
    %63 = arith.cmpi slt, %61, %62 : vector<1x256xi32>
    %64 = arith.andi %59, %63 : vector<1x256xi1>
    %c0_i32_26 = arith.constant 0 : i32
    %65 = vector.broadcast %c0_i32_26 : i32 to vector<1x256xi32>
    %66 = arith.addi %1, %65 : vector<1x256xi32>
    %c0_i32_27 = arith.constant 0 : i32
    %67 = vector.broadcast %c0_i32_27 : i32 to vector<1x256xi32>
    %68 = arith.cmpi sge, %66, %67 : vector<1x256xi32>
    %c0_i32_28 = arith.constant 0 : i32
    %69 = vector.broadcast %c0_i32_28 : i32 to vector<1x256xi32>
    %70 = arith.addi %1, %69 : vector<1x256xi32>
    %c16_i32_29 = arith.constant 16 : i32
    %71 = vector.broadcast %c16_i32_29 : i32 to vector<1x256xi32>
    %72 = arith.cmpi slt, %70, %71 : vector<1x256xi32>
    %73 = arith.andi %68, %72 : vector<1x256xi1>
    %c1_i32 = arith.constant 1 : i32
    %74 = vector.broadcast %c1_i32 : i32 to vector<1x256xi32>
    %75 = arith.addi %0, %74 : vector<1x256xi32>
    %c0_i32_30 = arith.constant 0 : i32
    %76 = vector.broadcast %c0_i32_30 : i32 to vector<1x256xi32>
    %77 = arith.cmpi sge, %75, %76 : vector<1x256xi32>
    %c1_i32_31 = arith.constant 1 : i32
    %78 = vector.broadcast %c1_i32_31 : i32 to vector<1x256xi32>
    %79 = arith.addi %0, %78 : vector<1x256xi32>
    %c16_i32_32 = arith.constant 16 : i32
    %80 = vector.broadcast %c16_i32_32 : i32 to vector<1x256xi32>
    %81 = arith.cmpi slt, %79, %80 : vector<1x256xi32>
    %82 = arith.andi %77, %81 : vector<1x256xi1>
    %c1_i32_33 = arith.constant 1 : i32
    %83 = vector.broadcast %c1_i32_33 : i32 to vector<1x256xi32>
    %84 = arith.addi %1, %83 : vector<1x256xi32>
    %c0_i32_34 = arith.constant 0 : i32
    %85 = vector.broadcast %c0_i32_34 : i32 to vector<1x256xi32>
    %86 = arith.cmpi sge, %84, %85 : vector<1x256xi32>
    %c1_i32_35 = arith.constant 1 : i32
    %87 = vector.broadcast %c1_i32_35 : i32 to vector<1x256xi32>
    %88 = arith.addi %1, %87 : vector<1x256xi32>
    %c16_i32_36 = arith.constant 16 : i32
    %89 = vector.broadcast %c16_i32_36 : i32 to vector<1x256xi32>
    %90 = arith.cmpi slt, %88, %89 : vector<1x256xi32>
    %91 = arith.andi %86, %90 : vector<1x256xi1>
    %c2_i32 = arith.constant 2 : i32
    %92 = vector.broadcast %c2_i32 : i32 to vector<1x256xi32>
    %93 = arith.addi %0, %92 : vector<1x256xi32>
    %c0_i32_37 = arith.constant 0 : i32
    %94 = vector.broadcast %c0_i32_37 : i32 to vector<1x256xi32>
    %95 = arith.cmpi sge, %93, %94 : vector<1x256xi32>
    %c2_i32_38 = arith.constant 2 : i32
    %96 = vector.broadcast %c2_i32_38 : i32 to vector<1x256xi32>
    %97 = arith.addi %0, %96 : vector<1x256xi32>
    %c16_i32_39 = arith.constant 16 : i32
    %98 = vector.broadcast %c16_i32_39 : i32 to vector<1x256xi32>
    %99 = arith.cmpi slt, %97, %98 : vector<1x256xi32>
    %100 = arith.andi %95, %99 : vector<1x256xi1>
    %c2_i32_40 = arith.constant 2 : i32
    %101 = vector.broadcast %c2_i32_40 : i32 to vector<1x256xi32>
    %102 = arith.addi %1, %101 : vector<1x256xi32>
    %c0_i32_41 = arith.constant 0 : i32
    %103 = vector.broadcast %c0_i32_41 : i32 to vector<1x256xi32>
    %104 = arith.cmpi sge, %102, %103 : vector<1x256xi32>
    %c2_i32_42 = arith.constant 2 : i32
    %105 = vector.broadcast %c2_i32_42 : i32 to vector<1x256xi32>
    %106 = arith.addi %1, %105 : vector<1x256xi32>
    %c16_i32_43 = arith.constant 16 : i32
    %107 = vector.broadcast %c16_i32_43 : i32 to vector<1x256xi32>
    %108 = arith.cmpi slt, %106, %107 : vector<1x256xi32>
    %109 = arith.andi %104, %108 : vector<1x256xi1>
    %c3_i32 = arith.constant 3 : i32
    %110 = vector.broadcast %c3_i32 : i32 to vector<1x256xi32>
    %111 = arith.addi %0, %110 : vector<1x256xi32>
    %c0_i32_44 = arith.constant 0 : i32
    %112 = vector.broadcast %c0_i32_44 : i32 to vector<1x256xi32>
    %113 = arith.cmpi sge, %111, %112 : vector<1x256xi32>
    %c3_i32_45 = arith.constant 3 : i32
    %114 = vector.broadcast %c3_i32_45 : i32 to vector<1x256xi32>
    %115 = arith.addi %0, %114 : vector<1x256xi32>
    %c16_i32_46 = arith.constant 16 : i32
    %116 = vector.broadcast %c16_i32_46 : i32 to vector<1x256xi32>
    %117 = arith.cmpi slt, %115, %116 : vector<1x256xi32>
    %118 = arith.andi %113, %117 : vector<1x256xi1>
    %c3_i32_47 = arith.constant 3 : i32
    %119 = vector.broadcast %c3_i32_47 : i32 to vector<1x256xi32>
    %120 = arith.addi %1, %119 : vector<1x256xi32>
    %c0_i32_48 = arith.constant 0 : i32
    %121 = vector.broadcast %c0_i32_48 : i32 to vector<1x256xi32>
    %122 = arith.cmpi sge, %120, %121 : vector<1x256xi32>
    %c3_i32_49 = arith.constant 3 : i32
    %123 = vector.broadcast %c3_i32_49 : i32 to vector<1x256xi32>
    %124 = arith.addi %1, %123 : vector<1x256xi32>
    %c16_i32_50 = arith.constant 16 : i32
    %125 = vector.broadcast %c16_i32_50 : i32 to vector<1x256xi32>
    %126 = arith.cmpi slt, %124, %125 : vector<1x256xi32>
    %127 = arith.andi %122, %126 : vector<1x256xi1>
    %cst = arith.constant 0.000000e+00 : f32
    %128 = vector.broadcast %cst : f32 to vector<1x4x256xf32>
    %cst_51 = arith.constant 0xFF800000 : f32
    %129 = vector.broadcast %cst_51 : f32 to vector<1x4x256xf32>
    %c0_i32_52 = arith.constant 0 : i32
    %c4_i32 = arith.constant 4 : i32
    %130 = arith.muli %c0_i32_52, %c4_i32 : i32
    %131 = tpu.assume_multiple %130, 4 : i32
    %c0_53 = arith.constant 0 : index
    %132 = arith.index_cast %131 : i32 to index
    %c0_54 = arith.constant 0 : index
    %133 = vector.load %arg4[%c0_53, %132, %c0_54] : memref<1x4x256xf32, #tpu.memory_space<vmem>>, vector<1x4x256xf32>
    %134 = arith.addf %128, %133 : vector<1x4x256xf32>
    %135 = arith.maximumf %129, %133 : vector<1x4x256xf32>
    %c1_i32_55 = arith.constant 1 : i32
    %cst_56 = arith.constant dense<0.000000e+00> : vector<1x256xf32>
    %136 = vector.multi_reduction <add>, %134, %cst_56 [1] : vector<1x4x256xf32> to vector<1x256xf32>
    %cst_57 = arith.constant dense<0xFF800000> : vector<1x256xf32>
    %137 = vector.multi_reduction <maximumf>, %135, %cst_57 [1] : vector<1x4x256xf32> to vector<1x256xf32>
    %cst_58 = arith.constant 2.500000e-01 : f32
    %138 = vector.broadcast %cst_58 : f32 to vector<1x256xf32>
    %139 = arith.mulf %136, %138 : vector<1x256xf32>
    %cst_59 = arith.constant 0.000000e+00 : f32
    %140 = vector.broadcast %cst_59 : f32 to vector<1x256xf32>
    %cst_60 = arith.constant 0.000000e+00 : f32
    %141 = vector.broadcast %cst_60 : f32 to vector<1x256xf32>
    %cst_61 = arith.constant 0.000000e+00 : f32
    %142 = vector.broadcast %cst_61 : f32 to vector<1x256xf32>
    %cst_62 = arith.constant 0.000000e+00 : f32
    %143 = vector.broadcast %cst_62 : f32 to vector<1x256xf32>
    %cst_63 = arith.constant 0.000000e+00 : f32
    %144 = vector.broadcast %cst_63 : f32 to vector<1x256xf32>
    %cst_64 = arith.constant 0.000000e+00 : f32
    %145 = vector.broadcast %cst_64 : f32 to vector<1x256xf32>
    %cst_65 = arith.constant 0.000000e+00 : f32
    %146 = vector.broadcast %cst_65 : f32 to vector<1x256xf32>
    %c48_i32 = arith.constant 48 : i32
    %147 = tpu.dynamic_rotate %139 by %c48_i32 dim 1 : vector<1x256xf32>, i32 -> vector<1x256xf32>
    %c48_i32_66 = arith.constant 48 : i32
    %148 = tpu.dynamic_rotate %137 by %c48_i32_66 dim 1 : vector<1x256xf32>, i32 -> vector<1x256xf32>
    %cst_67 = arith.constant 0.000000e+00 : f32
    %149 = vector.broadcast %cst_67 : f32 to vector<1x256xf32>
    %150 = arith.select %10, %147, %149 : vector<1x256xi1>, vector<1x256xf32>
    %cst_68 = arith.constant 0.000000e+00 : f32
    %151 = vector.broadcast %cst_68 : f32 to vector<1x256xf32>
    %152 = arith.select %10, %148, %151 : vector<1x256xi1>, vector<1x256xf32>
    %c0_69 = arith.constant 0 : index
    %153 = memref.load %arg1[%c0_69] : memref<98xf32, #tpu.memory_space<smem>>
    %c49 = arith.constant 49 : index
    %154 = memref.load %arg1[%c49] : memref<98xf32, #tpu.memory_space<smem>>
    %155 = vector.broadcast %153 : f32 to vector<1x256xf32>
    %156 = arith.mulf %155, %150 : vector<1x256xf32>
    %157 = arith.addf %140, %156 : vector<1x256xf32>
    %158 = vector.broadcast %154 : f32 to vector<1x256xf32>
    %159 = arith.mulf %158, %152 : vector<1x256xf32>
    %160 = arith.addf %157, %159 : vector<1x256xf32>
    %c1 = arith.constant 1 : index
    %161 = memref.load %arg1[%c1] : memref<98xf32, #tpu.memory_space<smem>>
    %c50 = arith.constant 50 : index
    %162 = memref.load %arg1[%c50] : memref<98xf32, #tpu.memory_space<smem>>
    %163 = vector.broadcast %161 : f32 to vector<1x256xf32>
    %164 = arith.mulf %163, %150 : vector<1x256xf32>
    %165 = arith.addf %141, %164 : vector<1x256xf32>
    %166 = vector.broadcast %162 : f32 to vector<1x256xf32>
    %167 = arith.mulf %166, %152 : vector<1x256xf32>
    %168 = arith.addf %165, %167 : vector<1x256xf32>
    %c2 = arith.constant 2 : index
    %169 = memref.load %arg1[%c2] : memref<98xf32, #tpu.memory_space<smem>>
    %c51 = arith.constant 51 : index
    %170 = memref.load %arg1[%c51] : memref<98xf32, #tpu.memory_space<smem>>
    %171 = vector.broadcast %169 : f32 to vector<1x256xf32>
    %172 = arith.mulf %171, %150 : vector<1x256xf32>
    %173 = arith.addf %142, %172 : vector<1x256xf32>
    %174 = vector.broadcast %170 : f32 to vector<1x256xf32>
    %175 = arith.mulf %174, %152 : vector<1x256xf32>
    %176 = arith.addf %173, %175 : vector<1x256xf32>
    %c3 = arith.constant 3 : index
    %177 = memref.load %arg1[%c3] : memref<98xf32, #tpu.memory_space<smem>>
    %c52 = arith.constant 52 : index
    %178 = memref.load %arg1[%c52] : memref<98xf32, #tpu.memory_space<smem>>
    %179 = vector.broadcast %177 : f32 to vector<1x256xf32>
    %180 = arith.mulf %179, %150 : vector<1x256xf32>
    %181 = arith.addf %143, %180 : vector<1x256xf32>
    %182 = vector.broadcast %178 : f32 to vector<1x256xf32>
    %183 = arith.mulf %182, %152 : vector<1x256xf32>
    %184 = arith.addf %181, %183 : vector<1x256xf32>
    %c4 = arith.constant 4 : index
    %185 = memref.load %arg1[%c4] : memref<98xf32, #tpu.memory_space<smem>>
    %c53 = arith.constant 53 : index
    %186 = memref.load %arg1[%c53] : memref<98xf32, #tpu.memory_space<smem>>
    %187 = vector.broadcast %185 : f32 to vector<1x256xf32>
    %188 = arith.mulf %187, %150 : vector<1x256xf32>
    %189 = arith.addf %144, %188 : vector<1x256xf32>
    %190 = vector.broadcast %186 : f32 to vector<1x256xf32>
    %191 = arith.mulf %190, %152 : vector<1x256xf32>
    %192 = arith.addf %189, %191 : vector<1x256xf32>
    %c5 = arith.constant 5 : index
    %193 = memref.load %arg1[%c5] : memref<98xf32, #tpu.memory_space<smem>>
    %c54 = arith.constant 54 : index
    %194 = memref.load %arg1[%c54] : memref<98xf32, #tpu.memory_space<smem>>
    %195 = vector.broadcast %193 : f32 to vector<1x256xf32>
    %196 = arith.mulf %195, %150 : vector<1x256xf32>
    %197 = arith.addf %145, %196 : vector<1x256xf32>
    %198 = vector.broadcast %194 : f32 to vector<1x256xf32>
    %199 = arith.mulf %198, %152 : vector<1x256xf32>
    %200 = arith.addf %197, %199 : vector<1x256xf32>
    %c6 = arith.constant 6 : index
    %201 = memref.load %arg1[%c6] : memref<98xf32, #tpu.memory_space<smem>>
    %c55 = arith.constant 55 : index
    %202 = memref.load %arg1[%c55] : memref<98xf32, #tpu.memory_space<smem>>
    %203 = vector.broadcast %201 : f32 to vector<1x256xf32>
    %204 = arith.mulf %203, %150 : vector<1x256xf32>
    %205 = arith.addf %146, %204 : vector<1x256xf32>
    %206 = vector.broadcast %202 : f32 to vector<1x256xf32>
    %207 = arith.mulf %206, %152 : vector<1x256xf32>
    %208 = arith.addf %205, %207 : vector<1x256xf32>
    %c32_i32 = arith.constant 32 : i32
    %209 = tpu.dynamic_rotate %139 by %c32_i32 dim 1 : vector<1x256xf32>, i32 -> vector<1x256xf32>
    %c32_i32_70 = arith.constant 32 : i32
    %210 = tpu.dynamic_rotate %137 by %c32_i32_70 dim 1 : vector<1x256xf32>, i32 -> vector<1x256xf32>
    %cst_71 = arith.constant 0.000000e+00 : f32
    %211 = vector.broadcast %cst_71 : f32 to vector<1x256xf32>
    %212 = arith.select %28, %209, %211 : vector<1x256xi1>, vector<1x256xf32>
    %cst_72 = arith.constant 0.000000e+00 : f32
    %213 = vector.broadcast %cst_72 : f32 to vector<1x256xf32>
    %214 = arith.select %28, %210, %213 : vector<1x256xi1>, vector<1x256xf32>
    %c7 = arith.constant 7 : index
    %215 = memref.load %arg1[%c7] : memref<98xf32, #tpu.memory_space<smem>>
    %c56 = arith.constant 56 : index
    %216 = memref.load %arg1[%c56] : memref<98xf32, #tpu.memory_space<smem>>
    %217 = vector.broadcast %215 : f32 to vector<1x256xf32>
    %218 = arith.mulf %217, %212 : vector<1x256xf32>
    %219 = arith.addf %160, %218 : vector<1x256xf32>
    %220 = vector.broadcast %216 : f32 to vector<1x256xf32>
    %221 = arith.mulf %220, %214 : vector<1x256xf32>
    %222 = arith.addf %219, %221 : vector<1x256xf32>
    %c8 = arith.constant 8 : index
    %223 = memref.load %arg1[%c8] : memref<98xf32, #tpu.memory_space<smem>>
    %c57 = arith.constant 57 : index
    %224 = memref.load %arg1[%c57] : memref<98xf32, #tpu.memory_space<smem>>
    %225 = vector.broadcast %223 : f32 to vector<1x256xf32>
    %226 = arith.mulf %225, %212 : vector<1x256xf32>
    %227 = arith.addf %168, %226 : vector<1x256xf32>
    %228 = vector.broadcast %224 : f32 to vector<1x256xf32>
    %229 = arith.mulf %228, %214 : vector<1x256xf32>
    %230 = arith.addf %227, %229 : vector<1x256xf32>
    %c9 = arith.constant 9 : index
    %231 = memref.load %arg1[%c9] : memref<98xf32, #tpu.memory_space<smem>>
    %c58 = arith.constant 58 : index
    %232 = memref.load %arg1[%c58] : memref<98xf32, #tpu.memory_space<smem>>
    %233 = vector.broadcast %231 : f32 to vector<1x256xf32>
    %234 = arith.mulf %233, %212 : vector<1x256xf32>
    %235 = arith.addf %176, %234 : vector<1x256xf32>
    %236 = vector.broadcast %232 : f32 to vector<1x256xf32>
    %237 = arith.mulf %236, %214 : vector<1x256xf32>
    %238 = arith.addf %235, %237 : vector<1x256xf32>
    %c10 = arith.constant 10 : index
    %239 = memref.load %arg1[%c10] : memref<98xf32, #tpu.memory_space<smem>>
    %c59 = arith.constant 59 : index
    %240 = memref.load %arg1[%c59] : memref<98xf32, #tpu.memory_space<smem>>
    %241 = vector.broadcast %239 : f32 to vector<1x256xf32>
    %242 = arith.mulf %241, %212 : vector<1x256xf32>
    %243 = arith.addf %184, %242 : vector<1x256xf32>
    %244 = vector.broadcast %240 : f32 to vector<1x256xf32>
    %245 = arith.mulf %244, %214 : vector<1x256xf32>
    %246 = arith.addf %243, %245 : vector<1x256xf32>
    %c11 = arith.constant 11 : index
    %247 = memref.load %arg1[%c11] : memref<98xf32, #tpu.memory_space<smem>>
    %c60 = arith.constant 60 : index
    %248 = memref.load %arg1[%c60] : memref<98xf32, #tpu.memory_space<smem>>
    %249 = vector.broadcast %247 : f32 to vector<1x256xf32>
    %250 = arith.mulf %249, %212 : vector<1x256xf32>
    %251 = arith.addf %192, %250 : vector<1x256xf32>
    %252 = vector.broadcast %248 : f32 to vector<1x256xf32>
    %253 = arith.mulf %252, %214 : vector<1x256xf32>
    %254 = arith.addf %251, %253 : vector<1x256xf32>
    %c12 = arith.constant 12 : index
    %255 = memref.load %arg1[%c12] : memref<98xf32, #tpu.memory_space<smem>>
    %c61 = arith.constant 61 : index
    %256 = memref.load %arg1[%c61] : memref<98xf32, #tpu.memory_space<smem>>
    %257 = vector.broadcast %255 : f32 to vector<1x256xf32>
    %258 = arith.mulf %257, %212 : vector<1x256xf32>
    %259 = arith.addf %200, %258 : vector<1x256xf32>
    %260 = vector.broadcast %256 : f32 to vector<1x256xf32>
    %261 = arith.mulf %260, %214 : vector<1x256xf32>
    %262 = arith.addf %259, %261 : vector<1x256xf32>
    %c13 = arith.constant 13 : index
    %263 = memref.load %arg1[%c13] : memref<98xf32, #tpu.memory_space<smem>>
    %c62 = arith.constant 62 : index
    %264 = memref.load %arg1[%c62] : memref<98xf32, #tpu.memory_space<smem>>
    %265 = vector.broadcast %263 : f32 to vector<1x256xf32>
    %266 = arith.mulf %265, %212 : vector<1x256xf32>
    %267 = arith.addf %208, %266 : vector<1x256xf32>
    %268 = vector.broadcast %264 : f32 to vector<1x256xf32>
    %269 = arith.mulf %268, %214 : vector<1x256xf32>
    %270 = arith.addf %267, %269 : vector<1x256xf32>
    %c16_i32_73 = arith.constant 16 : i32
    %271 = tpu.dynamic_rotate %139 by %c16_i32_73 dim 1 : vector<1x256xf32>, i32 -> vector<1x256xf32>
    %c16_i32_74 = arith.constant 16 : i32
    %272 = tpu.dynamic_rotate %137 by %c16_i32_74 dim 1 : vector<1x256xf32>, i32 -> vector<1x256xf32>
    %cst_75 = arith.constant 0.000000e+00 : f32
    %273 = vector.broadcast %cst_75 : f32 to vector<1x256xf32>
    %274 = arith.select %46, %271, %273 : vector<1x256xi1>, vector<1x256xf32>
    %cst_76 = arith.constant 0.000000e+00 : f32
    %275 = vector.broadcast %cst_76 : f32 to vector<1x256xf32>
    %276 = arith.select %46, %272, %275 : vector<1x256xi1>, vector<1x256xf32>
    %c14 = arith.constant 14 : index
    %277 = memref.load %arg1[%c14] : memref<98xf32, #tpu.memory_space<smem>>
    %c63 = arith.constant 63 : index
    %278 = memref.load %arg1[%c63] : memref<98xf32, #tpu.memory_space<smem>>
    %279 = vector.broadcast %277 : f32 to vector<1x256xf32>
    %280 = arith.mulf %279, %274 : vector<1x256xf32>
    %281 = arith.addf %222, %280 : vector<1x256xf32>
    %282 = vector.broadcast %278 : f32 to vector<1x256xf32>
    %283 = arith.mulf %282, %276 : vector<1x256xf32>
    %284 = arith.addf %281, %283 : vector<1x256xf32>
    %c15 = arith.constant 15 : index
    %285 = memref.load %arg1[%c15] : memref<98xf32, #tpu.memory_space<smem>>
    %c64 = arith.constant 64 : index
    %286 = memref.load %arg1[%c64] : memref<98xf32, #tpu.memory_space<smem>>
    %287 = vector.broadcast %285 : f32 to vector<1x256xf32>
    %288 = arith.mulf %287, %274 : vector<1x256xf32>
    %289 = arith.addf %230, %288 : vector<1x256xf32>
    %290 = vector.broadcast %286 : f32 to vector<1x256xf32>
    %291 = arith.mulf %290, %276 : vector<1x256xf32>
    %292 = arith.addf %289, %291 : vector<1x256xf32>
    %c16 = arith.constant 16 : index
    %293 = memref.load %arg1[%c16] : memref<98xf32, #tpu.memory_space<smem>>
    %c65 = arith.constant 65 : index
    %294 = memref.load %arg1[%c65] : memref<98xf32, #tpu.memory_space<smem>>
    %295 = vector.broadcast %293 : f32 to vector<1x256xf32>
    %296 = arith.mulf %295, %274 : vector<1x256xf32>
    %297 = arith.addf %238, %296 : vector<1x256xf32>
    %298 = vector.broadcast %294 : f32 to vector<1x256xf32>
    %299 = arith.mulf %298, %276 : vector<1x256xf32>
    %300 = arith.addf %297, %299 : vector<1x256xf32>
    %c17 = arith.constant 17 : index
    %301 = memref.load %arg1[%c17] : memref<98xf32, #tpu.memory_space<smem>>
    %c66 = arith.constant 66 : index
    %302 = memref.load %arg1[%c66] : memref<98xf32, #tpu.memory_space<smem>>
    %303 = vector.broadcast %301 : f32 to vector<1x256xf32>
    %304 = arith.mulf %303, %274 : vector<1x256xf32>
    %305 = arith.addf %246, %304 : vector<1x256xf32>
    %306 = vector.broadcast %302 : f32 to vector<1x256xf32>
    %307 = arith.mulf %306, %276 : vector<1x256xf32>
    %308 = arith.addf %305, %307 : vector<1x256xf32>
    %c18 = arith.constant 18 : index
    %309 = memref.load %arg1[%c18] : memref<98xf32, #tpu.memory_space<smem>>
    %c67 = arith.constant 67 : index
    %310 = memref.load %arg1[%c67] : memref<98xf32, #tpu.memory_space<smem>>
    %311 = vector.broadcast %309 : f32 to vector<1x256xf32>
    %312 = arith.mulf %311, %274 : vector<1x256xf32>
    %313 = arith.addf %254, %312 : vector<1x256xf32>
    %314 = vector.broadcast %310 : f32 to vector<1x256xf32>
    %315 = arith.mulf %314, %276 : vector<1x256xf32>
    %316 = arith.addf %313, %315 : vector<1x256xf32>
    %c19 = arith.constant 19 : index
    %317 = memref.load %arg1[%c19] : memref<98xf32, #tpu.memory_space<smem>>
    %c68 = arith.constant 68 : index
    %318 = memref.load %arg1[%c68] : memref<98xf32, #tpu.memory_space<smem>>
    %319 = vector.broadcast %317 : f32 to vector<1x256xf32>
    %320 = arith.mulf %319, %274 : vector<1x256xf32>
    %321 = arith.addf %262, %320 : vector<1x256xf32>
    %322 = vector.broadcast %318 : f32 to vector<1x256xf32>
    %323 = arith.mulf %322, %276 : vector<1x256xf32>
    %324 = arith.addf %321, %323 : vector<1x256xf32>
    %c20 = arith.constant 20 : index
    %325 = memref.load %arg1[%c20] : memref<98xf32, #tpu.memory_space<smem>>
    %c69 = arith.constant 69 : index
    %326 = memref.load %arg1[%c69] : memref<98xf32, #tpu.memory_space<smem>>
    %327 = vector.broadcast %325 : f32 to vector<1x256xf32>
    %328 = arith.mulf %327, %274 : vector<1x256xf32>
    %329 = arith.addf %270, %328 : vector<1x256xf32>
    %330 = vector.broadcast %326 : f32 to vector<1x256xf32>
    %331 = arith.mulf %330, %276 : vector<1x256xf32>
    %332 = arith.addf %329, %331 : vector<1x256xf32>
    %cst_77 = arith.constant 0.000000e+00 : f32
    %333 = vector.broadcast %cst_77 : f32 to vector<1x256xf32>
    %334 = arith.select %64, %139, %333 : vector<1x256xi1>, vector<1x256xf32>
    %cst_78 = arith.constant 0.000000e+00 : f32
    %335 = vector.broadcast %cst_78 : f32 to vector<1x256xf32>
    %336 = arith.select %64, %137, %335 : vector<1x256xi1>, vector<1x256xf32>
    %c21 = arith.constant 21 : index
    %337 = memref.load %arg1[%c21] : memref<98xf32, #tpu.memory_space<smem>>
    %c70 = arith.constant 70 : index
    %338 = memref.load %arg1[%c70] : memref<98xf32, #tpu.memory_space<smem>>
    %339 = vector.broadcast %337 : f32 to vector<1x256xf32>
    %340 = arith.mulf %339, %334 : vector<1x256xf32>
    %341 = arith.addf %284, %340 : vector<1x256xf32>
    %342 = vector.broadcast %338 : f32 to vector<1x256xf32>
    %343 = arith.mulf %342, %336 : vector<1x256xf32>
    %344 = arith.addf %341, %343 : vector<1x256xf32>
    %c22 = arith.constant 22 : index
    %345 = memref.load %arg1[%c22] : memref<98xf32, #tpu.memory_space<smem>>
    %c71 = arith.constant 71 : index
    %346 = memref.load %arg1[%c71] : memref<98xf32, #tpu.memory_space<smem>>
    %347 = vector.broadcast %345 : f32 to vector<1x256xf32>
    %348 = arith.mulf %347, %334 : vector<1x256xf32>
    %349 = arith.addf %292, %348 : vector<1x256xf32>
    %350 = vector.broadcast %346 : f32 to vector<1x256xf32>
    %351 = arith.mulf %350, %336 : vector<1x256xf32>
    %352 = arith.addf %349, %351 : vector<1x256xf32>
    %c23 = arith.constant 23 : index
    %353 = memref.load %arg1[%c23] : memref<98xf32, #tpu.memory_space<smem>>
    %c72 = arith.constant 72 : index
    %354 = memref.load %arg1[%c72] : memref<98xf32, #tpu.memory_space<smem>>
    %355 = vector.broadcast %353 : f32 to vector<1x256xf32>
    %356 = arith.mulf %355, %334 : vector<1x256xf32>
    %357 = arith.addf %300, %356 : vector<1x256xf32>
    %358 = vector.broadcast %354 : f32 to vector<1x256xf32>
    %359 = arith.mulf %358, %336 : vector<1x256xf32>
    %360 = arith.addf %357, %359 : vector<1x256xf32>
    %c24 = arith.constant 24 : index
    %361 = memref.load %arg1[%c24] : memref<98xf32, #tpu.memory_space<smem>>
    %c73 = arith.constant 73 : index
    %362 = memref.load %arg1[%c73] : memref<98xf32, #tpu.memory_space<smem>>
    %363 = vector.broadcast %361 : f32 to vector<1x256xf32>
    %364 = arith.mulf %363, %334 : vector<1x256xf32>
    %365 = arith.addf %308, %364 : vector<1x256xf32>
    %366 = vector.broadcast %362 : f32 to vector<1x256xf32>
    %367 = arith.mulf %366, %336 : vector<1x256xf32>
    %368 = arith.addf %365, %367 : vector<1x256xf32>
    %c25 = arith.constant 25 : index
    %369 = memref.load %arg1[%c25] : memref<98xf32, #tpu.memory_space<smem>>
    %c74 = arith.constant 74 : index
    %370 = memref.load %arg1[%c74] : memref<98xf32, #tpu.memory_space<smem>>
    %371 = vector.broadcast %369 : f32 to vector<1x256xf32>
    %372 = arith.mulf %371, %334 : vector<1x256xf32>
    %373 = arith.addf %316, %372 : vector<1x256xf32>
    %374 = vector.broadcast %370 : f32 to vector<1x256xf32>
    %375 = arith.mulf %374, %336 : vector<1x256xf32>
    %376 = arith.addf %373, %375 : vector<1x256xf32>
    %c26 = arith.constant 26 : index
    %377 = memref.load %arg1[%c26] : memref<98xf32, #tpu.memory_space<smem>>
    %c75 = arith.constant 75 : index
    %378 = memref.load %arg1[%c75] : memref<98xf32, #tpu.memory_space<smem>>
    %379 = vector.broadcast %377 : f32 to vector<1x256xf32>
    %380 = arith.mulf %379, %334 : vector<1x256xf32>
    %381 = arith.addf %324, %380 : vector<1x256xf32>
    %382 = vector.broadcast %378 : f32 to vector<1x256xf32>
    %383 = arith.mulf %382, %336 : vector<1x256xf32>
    %384 = arith.addf %381, %383 : vector<1x256xf32>
    %c27 = arith.constant 27 : index
    %385 = memref.load %arg1[%c27] : memref<98xf32, #tpu.memory_space<smem>>
    %c76 = arith.constant 76 : index
    %386 = memref.load %arg1[%c76] : memref<98xf32, #tpu.memory_space<smem>>
    %387 = vector.broadcast %385 : f32 to vector<1x256xf32>
    %388 = arith.mulf %387, %334 : vector<1x256xf32>
    %389 = arith.addf %332, %388 : vector<1x256xf32>
    %390 = vector.broadcast %386 : f32 to vector<1x256xf32>
    %391 = arith.mulf %390, %336 : vector<1x256xf32>
    %392 = arith.addf %389, %391 : vector<1x256xf32>
    %c240_i32 = arith.constant 240 : i32
    %393 = tpu.dynamic_rotate %139 by %c240_i32 dim 1 : vector<1x256xf32>, i32 -> vector<1x256xf32>
    %c240_i32_79 = arith.constant 240 : i32
    %394 = tpu.dynamic_rotate %137 by %c240_i32_79 dim 1 : vector<1x256xf32>, i32 -> vector<1x256xf32>
    %cst_80 = arith.constant 0.000000e+00 : f32
    %395 = vector.broadcast %cst_80 : f32 to vector<1x256xf32>
    %396 = arith.select %82, %393, %395 : vector<1x256xi1>, vector<1x256xf32>
    %cst_81 = arith.constant 0.000000e+00 : f32
    %397 = vector.broadcast %cst_81 : f32 to vector<1x256xf32>
    %398 = arith.select %82, %394, %397 : vector<1x256xi1>, vector<1x256xf32>
    %c28 = arith.constant 28 : index
    %399 = memref.load %arg1[%c28] : memref<98xf32, #tpu.memory_space<smem>>
    %c77 = arith.constant 77 : index
    %400 = memref.load %arg1[%c77] : memref<98xf32, #tpu.memory_space<smem>>
    %401 = vector.broadcast %399 : f32 to vector<1x256xf32>
    %402 = arith.mulf %401, %396 : vector<1x256xf32>
    %403 = arith.addf %344, %402 : vector<1x256xf32>
    %404 = vector.broadcast %400 : f32 to vector<1x256xf32>
    %405 = arith.mulf %404, %398 : vector<1x256xf32>
    %406 = arith.addf %403, %405 : vector<1x256xf32>
    %c29 = arith.constant 29 : index
    %407 = memref.load %arg1[%c29] : memref<98xf32, #tpu.memory_space<smem>>
    %c78 = arith.constant 78 : index
    %408 = memref.load %arg1[%c78] : memref<98xf32, #tpu.memory_space<smem>>
    %409 = vector.broadcast %407 : f32 to vector<1x256xf32>
    %410 = arith.mulf %409, %396 : vector<1x256xf32>
    %411 = arith.addf %352, %410 : vector<1x256xf32>
    %412 = vector.broadcast %408 : f32 to vector<1x256xf32>
    %413 = arith.mulf %412, %398 : vector<1x256xf32>
    %414 = arith.addf %411, %413 : vector<1x256xf32>
    %c30 = arith.constant 30 : index
    %415 = memref.load %arg1[%c30] : memref<98xf32, #tpu.memory_space<smem>>
    %c79 = arith.constant 79 : index
    %416 = memref.load %arg1[%c79] : memref<98xf32, #tpu.memory_space<smem>>
    %417 = vector.broadcast %415 : f32 to vector<1x256xf32>
    %418 = arith.mulf %417, %396 : vector<1x256xf32>
    %419 = arith.addf %360, %418 : vector<1x256xf32>
    %420 = vector.broadcast %416 : f32 to vector<1x256xf32>
    %421 = arith.mulf %420, %398 : vector<1x256xf32>
    %422 = arith.addf %419, %421 : vector<1x256xf32>
    %c31 = arith.constant 31 : index
    %423 = memref.load %arg1[%c31] : memref<98xf32, #tpu.memory_space<smem>>
    %c80 = arith.constant 80 : index
    %424 = memref.load %arg1[%c80] : memref<98xf32, #tpu.memory_space<smem>>
    %425 = vector.broadcast %423 : f32 to vector<1x256xf32>
    %426 = arith.mulf %425, %396 : vector<1x256xf32>
    %427 = arith.addf %368, %426 : vector<1x256xf32>
    %428 = vector.broadcast %424 : f32 to vector<1x256xf32>
    %429 = arith.mulf %428, %398 : vector<1x256xf32>
    %430 = arith.addf %427, %429 : vector<1x256xf32>
    %c32 = arith.constant 32 : index
    %431 = memref.load %arg1[%c32] : memref<98xf32, #tpu.memory_space<smem>>
    %c81 = arith.constant 81 : index
    %432 = memref.load %arg1[%c81] : memref<98xf32, #tpu.memory_space<smem>>
    %433 = vector.broadcast %431 : f32 to vector<1x256xf32>
    %434 = arith.mulf %433, %396 : vector<1x256xf32>
    %435 = arith.addf %376, %434 : vector<1x256xf32>
    %436 = vector.broadcast %432 : f32 to vector<1x256xf32>
    %437 = arith.mulf %436, %398 : vector<1x256xf32>
    %438 = arith.addf %435, %437 : vector<1x256xf32>
    %c33 = arith.constant 33 : index
    %439 = memref.load %arg1[%c33] : memref<98xf32, #tpu.memory_space<smem>>
    %c82 = arith.constant 82 : index
    %440 = memref.load %arg1[%c82] : memref<98xf32, #tpu.memory_space<smem>>
    %441 = vector.broadcast %439 : f32 to vector<1x256xf32>
    %442 = arith.mulf %441, %396 : vector<1x256xf32>
    %443 = arith.addf %384, %442 : vector<1x256xf32>
    %444 = vector.broadcast %440 : f32 to vector<1x256xf32>
    %445 = arith.mulf %444, %398 : vector<1x256xf32>
    %446 = arith.addf %443, %445 : vector<1x256xf32>
    %c34 = arith.constant 34 : index
    %447 = memref.load %arg1[%c34] : memref<98xf32, #tpu.memory_space<smem>>
    %c83 = arith.constant 83 : index
    %448 = memref.load %arg1[%c83] : memref<98xf32, #tpu.memory_space<smem>>
    %449 = vector.broadcast %447 : f32 to vector<1x256xf32>
    %450 = arith.mulf %449, %396 : vector<1x256xf32>
    %451 = arith.addf %392, %450 : vector<1x256xf32>
    %452 = vector.broadcast %448 : f32 to vector<1x256xf32>
    %453 = arith.mulf %452, %398 : vector<1x256xf32>
    %454 = arith.addf %451, %453 : vector<1x256xf32>
    %c224_i32 = arith.constant 224 : i32
    %455 = tpu.dynamic_rotate %139 by %c224_i32 dim 1 : vector<1x256xf32>, i32 -> vector<1x256xf32>
    %c224_i32_82 = arith.constant 224 : i32
    %456 = tpu.dynamic_rotate %137 by %c224_i32_82 dim 1 : vector<1x256xf32>, i32 -> vector<1x256xf32>
    %cst_83 = arith.constant 0.000000e+00 : f32
    %457 = vector.broadcast %cst_83 : f32 to vector<1x256xf32>
    %458 = arith.select %100, %455, %457 : vector<1x256xi1>, vector<1x256xf32>
    %cst_84 = arith.constant 0.000000e+00 : f32
    %459 = vector.broadcast %cst_84 : f32 to vector<1x256xf32>
    %460 = arith.select %100, %456, %459 : vector<1x256xi1>, vector<1x256xf32>
    %c35 = arith.constant 35 : index
    %461 = memref.load %arg1[%c35] : memref<98xf32, #tpu.memory_space<smem>>
    %c84 = arith.constant 84 : index
    %462 = memref.load %arg1[%c84] : memref<98xf32, #tpu.memory_space<smem>>
    %463 = vector.broadcast %461 : f32 to vector<1x256xf32>
    %464 = arith.mulf %463, %458 : vector<1x256xf32>
    %465 = arith.addf %406, %464 : vector<1x256xf32>
    %466 = vector.broadcast %462 : f32 to vector<1x256xf32>
    %467 = arith.mulf %466, %460 : vector<1x256xf32>
    %468 = arith.addf %465, %467 : vector<1x256xf32>
    %c36 = arith.constant 36 : index
    %469 = memref.load %arg1[%c36] : memref<98xf32, #tpu.memory_space<smem>>
    %c85 = arith.constant 85 : index
    %470 = memref.load %arg1[%c85] : memref<98xf32, #tpu.memory_space<smem>>
    %471 = vector.broadcast %469 : f32 to vector<1x256xf32>
    %472 = arith.mulf %471, %458 : vector<1x256xf32>
    %473 = arith.addf %414, %472 : vector<1x256xf32>
    %474 = vector.broadcast %470 : f32 to vector<1x256xf32>
    %475 = arith.mulf %474, %460 : vector<1x256xf32>
    %476 = arith.addf %473, %475 : vector<1x256xf32>
    %c37 = arith.constant 37 : index
    %477 = memref.load %arg1[%c37] : memref<98xf32, #tpu.memory_space<smem>>
    %c86 = arith.constant 86 : index
    %478 = memref.load %arg1[%c86] : memref<98xf32, #tpu.memory_space<smem>>
    %479 = vector.broadcast %477 : f32 to vector<1x256xf32>
    %480 = arith.mulf %479, %458 : vector<1x256xf32>
    %481 = arith.addf %422, %480 : vector<1x256xf32>
    %482 = vector.broadcast %478 : f32 to vector<1x256xf32>
    %483 = arith.mulf %482, %460 : vector<1x256xf32>
    %484 = arith.addf %481, %483 : vector<1x256xf32>
    %c38 = arith.constant 38 : index
    %485 = memref.load %arg1[%c38] : memref<98xf32, #tpu.memory_space<smem>>
    %c87 = arith.constant 87 : index
    %486 = memref.load %arg1[%c87] : memref<98xf32, #tpu.memory_space<smem>>
    %487 = vector.broadcast %485 : f32 to vector<1x256xf32>
    %488 = arith.mulf %487, %458 : vector<1x256xf32>
    %489 = arith.addf %430, %488 : vector<1x256xf32>
    %490 = vector.broadcast %486 : f32 to vector<1x256xf32>
    %491 = arith.mulf %490, %460 : vector<1x256xf32>
    %492 = arith.addf %489, %491 : vector<1x256xf32>
    %c39 = arith.constant 39 : index
    %493 = memref.load %arg1[%c39] : memref<98xf32, #tpu.memory_space<smem>>
    %c88 = arith.constant 88 : index
    %494 = memref.load %arg1[%c88] : memref<98xf32, #tpu.memory_space<smem>>
    %495 = vector.broadcast %493 : f32 to vector<1x256xf32>
    %496 = arith.mulf %495, %458 : vector<1x256xf32>
    %497 = arith.addf %438, %496 : vector<1x256xf32>
    %498 = vector.broadcast %494 : f32 to vector<1x256xf32>
    %499 = arith.mulf %498, %460 : vector<1x256xf32>
    %500 = arith.addf %497, %499 : vector<1x256xf32>
    %c40 = arith.constant 40 : index
    %501 = memref.load %arg1[%c40] : memref<98xf32, #tpu.memory_space<smem>>
    %c89 = arith.constant 89 : index
    %502 = memref.load %arg1[%c89] : memref<98xf32, #tpu.memory_space<smem>>
    %503 = vector.broadcast %501 : f32 to vector<1x256xf32>
    %504 = arith.mulf %503, %458 : vector<1x256xf32>
    %505 = arith.addf %446, %504 : vector<1x256xf32>
    %506 = vector.broadcast %502 : f32 to vector<1x256xf32>
    %507 = arith.mulf %506, %460 : vector<1x256xf32>
    %508 = arith.addf %505, %507 : vector<1x256xf32>
    %c41 = arith.constant 41 : index
    %509 = memref.load %arg1[%c41] : memref<98xf32, #tpu.memory_space<smem>>
    %c90 = arith.constant 90 : index
    %510 = memref.load %arg1[%c90] : memref<98xf32, #tpu.memory_space<smem>>
    %511 = vector.broadcast %509 : f32 to vector<1x256xf32>
    %512 = arith.mulf %511, %458 : vector<1x256xf32>
    %513 = arith.addf %454, %512 : vector<1x256xf32>
    %514 = vector.broadcast %510 : f32 to vector<1x256xf32>
    %515 = arith.mulf %514, %460 : vector<1x256xf32>
    %516 = arith.addf %513, %515 : vector<1x256xf32>
    %c208_i32 = arith.constant 208 : i32
    %517 = tpu.dynamic_rotate %139 by %c208_i32 dim 1 : vector<1x256xf32>, i32 -> vector<1x256xf32>
    %c208_i32_85 = arith.constant 208 : i32
    %518 = tpu.dynamic_rotate %137 by %c208_i32_85 dim 1 : vector<1x256xf32>, i32 -> vector<1x256xf32>
    %cst_86 = arith.constant 0.000000e+00 : f32
    %519 = vector.broadcast %cst_86 : f32 to vector<1x256xf32>
    %520 = arith.select %118, %517, %519 : vector<1x256xi1>, vector<1x256xf32>
    %cst_87 = arith.constant 0.000000e+00 : f32
    %521 = vector.broadcast %cst_87 : f32 to vector<1x256xf32>
    %522 = arith.select %118, %518, %521 : vector<1x256xi1>, vector<1x256xf32>
    %c42 = arith.constant 42 : index
    %523 = memref.load %arg1[%c42] : memref<98xf32, #tpu.memory_space<smem>>
    %c91 = arith.constant 91 : index
    %524 = memref.load %arg1[%c91] : memref<98xf32, #tpu.memory_space<smem>>
    %525 = vector.broadcast %523 : f32 to vector<1x256xf32>
    %526 = arith.mulf %525, %520 : vector<1x256xf32>
    %527 = arith.addf %468, %526 : vector<1x256xf32>
    %528 = vector.broadcast %524 : f32 to vector<1x256xf32>
    %529 = arith.mulf %528, %522 : vector<1x256xf32>
    %530 = arith.addf %527, %529 : vector<1x256xf32>
    %c43 = arith.constant 43 : index
    %531 = memref.load %arg1[%c43] : memref<98xf32, #tpu.memory_space<smem>>
    %c92 = arith.constant 92 : index
    %532 = memref.load %arg1[%c92] : memref<98xf32, #tpu.memory_space<smem>>
    %533 = vector.broadcast %531 : f32 to vector<1x256xf32>
    %534 = arith.mulf %533, %520 : vector<1x256xf32>
    %535 = arith.addf %476, %534 : vector<1x256xf32>
    %536 = vector.broadcast %532 : f32 to vector<1x256xf32>
    %537 = arith.mulf %536, %522 : vector<1x256xf32>
    %538 = arith.addf %535, %537 : vector<1x256xf32>
    %c44 = arith.constant 44 : index
    %539 = memref.load %arg1[%c44] : memref<98xf32, #tpu.memory_space<smem>>
    %c93 = arith.constant 93 : index
    %540 = memref.load %arg1[%c93] : memref<98xf32, #tpu.memory_space<smem>>
    %541 = vector.broadcast %539 : f32 to vector<1x256xf32>
    %542 = arith.mulf %541, %520 : vector<1x256xf32>
    %543 = arith.addf %484, %542 : vector<1x256xf32>
    %544 = vector.broadcast %540 : f32 to vector<1x256xf32>
    %545 = arith.mulf %544, %522 : vector<1x256xf32>
    %546 = arith.addf %543, %545 : vector<1x256xf32>
    %c45 = arith.constant 45 : index
    %547 = memref.load %arg1[%c45] : memref<98xf32, #tpu.memory_space<smem>>
    %c94 = arith.constant 94 : index
    %548 = memref.load %arg1[%c94] : memref<98xf32, #tpu.memory_space<smem>>
    %549 = vector.broadcast %547 : f32 to vector<1x256xf32>
    %550 = arith.mulf %549, %520 : vector<1x256xf32>
    %551 = arith.addf %492, %550 : vector<1x256xf32>
    %552 = vector.broadcast %548 : f32 to vector<1x256xf32>
    %553 = arith.mulf %552, %522 : vector<1x256xf32>
    %554 = arith.addf %551, %553 : vector<1x256xf32>
    %c46 = arith.constant 46 : index
    %555 = memref.load %arg1[%c46] : memref<98xf32, #tpu.memory_space<smem>>
    %c95 = arith.constant 95 : index
    %556 = memref.load %arg1[%c95] : memref<98xf32, #tpu.memory_space<smem>>
    %557 = vector.broadcast %555 : f32 to vector<1x256xf32>
    %558 = arith.mulf %557, %520 : vector<1x256xf32>
    %559 = arith.addf %500, %558 : vector<1x256xf32>
    %560 = vector.broadcast %556 : f32 to vector<1x256xf32>
    %561 = arith.mulf %560, %522 : vector<1x256xf32>
    %562 = arith.addf %559, %561 : vector<1x256xf32>
    %c47 = arith.constant 47 : index
    %563 = memref.load %arg1[%c47] : memref<98xf32, #tpu.memory_space<smem>>
    %c96 = arith.constant 96 : index
    %564 = memref.load %arg1[%c96] : memref<98xf32, #tpu.memory_space<smem>>
    %565 = vector.broadcast %563 : f32 to vector<1x256xf32>
    %566 = arith.mulf %565, %520 : vector<1x256xf32>
    %567 = arith.addf %508, %566 : vector<1x256xf32>
    %568 = vector.broadcast %564 : f32 to vector<1x256xf32>
    %569 = arith.mulf %568, %522 : vector<1x256xf32>
    %570 = arith.addf %567, %569 : vector<1x256xf32>
    %c48 = arith.constant 48 : index
    %571 = memref.load %arg1[%c48] : memref<98xf32, #tpu.memory_space<smem>>
    %c97 = arith.constant 97 : index
    %572 = memref.load %arg1[%c97] : memref<98xf32, #tpu.memory_space<smem>>
    %573 = vector.broadcast %571 : f32 to vector<1x256xf32>
    %574 = arith.mulf %573, %520 : vector<1x256xf32>
    %575 = arith.addf %516, %574 : vector<1x256xf32>
    %576 = vector.broadcast %572 : f32 to vector<1x256xf32>
    %577 = arith.mulf %576, %522 : vector<1x256xf32>
    %578 = arith.addf %575, %577 : vector<1x256xf32>
    %cst_88 = arith.constant 0.000000e+00 : f32
    %579 = vector.broadcast %cst_88 : f32 to vector<1x256xf32>
    %c3_i32_89 = arith.constant 3 : i32
    %580 = tpu.dynamic_rotate %530 by %c3_i32_89 dim 1 : vector<1x256xf32>, i32 -> vector<1x256xf32>
    %cst_90 = arith.constant 0.000000e+00 : f32
    %581 = vector.broadcast %cst_90 : f32 to vector<1x256xf32>
    %582 = arith.select %19, %580, %581 : vector<1x256xi1>, vector<1x256xf32>
    %583 = arith.addf %579, %582 : vector<1x256xf32>
    %c2_i32_91 = arith.constant 2 : i32
    %584 = tpu.dynamic_rotate %538 by %c2_i32_91 dim 1 : vector<1x256xf32>, i32 -> vector<1x256xf32>
    %cst_92 = arith.constant 0.000000e+00 : f32
    %585 = vector.broadcast %cst_92 : f32 to vector<1x256xf32>
    %586 = arith.select %37, %584, %585 : vector<1x256xi1>, vector<1x256xf32>
    %587 = arith.addf %583, %586 : vector<1x256xf32>
    %c1_i32_93 = arith.constant 1 : i32
    %588 = tpu.dynamic_rotate %546 by %c1_i32_93 dim 1 : vector<1x256xf32>, i32 -> vector<1x256xf32>
    %cst_94 = arith.constant 0.000000e+00 : f32
    %589 = vector.broadcast %cst_94 : f32 to vector<1x256xf32>
    %590 = arith.select %55, %588, %589 : vector<1x256xi1>, vector<1x256xf32>
    %591 = arith.addf %587, %590 : vector<1x256xf32>
    %cst_95 = arith.constant 0.000000e+00 : f32
    %592 = vector.broadcast %cst_95 : f32 to vector<1x256xf32>
    %593 = arith.select %73, %554, %592 : vector<1x256xi1>, vector<1x256xf32>
    %594 = arith.addf %591, %593 : vector<1x256xf32>
    %c255_i32 = arith.constant 255 : i32
    %595 = tpu.dynamic_rotate %562 by %c255_i32 dim 1 : vector<1x256xf32>, i32 -> vector<1x256xf32>
    %cst_96 = arith.constant 0.000000e+00 : f32
    %596 = vector.broadcast %cst_96 : f32 to vector<1x256xf32>
    %597 = arith.select %91, %595, %596 : vector<1x256xi1>, vector<1x256xf32>
    %598 = arith.addf %594, %597 : vector<1x256xf32>
    %c254_i32 = arith.constant 254 : i32
    %599 = tpu.dynamic_rotate %570 by %c254_i32 dim 1 : vector<1x256xf32>, i32 -> vector<1x256xf32>
    %cst_97 = arith.constant 0.000000e+00 : f32
    %600 = vector.broadcast %cst_97 : f32 to vector<1x256xf32>
    %601 = arith.select %109, %599, %600 : vector<1x256xi1>, vector<1x256xf32>
    %602 = arith.addf %598, %601 : vector<1x256xf32>
    %c253_i32 = arith.constant 253 : i32
    %603 = tpu.dynamic_rotate %578 by %c253_i32 dim 1 : vector<1x256xf32>, i32 -> vector<1x256xf32>
    %cst_98 = arith.constant 0.000000e+00 : f32
    %604 = vector.broadcast %cst_98 : f32 to vector<1x256xf32>
    %605 = arith.select %127, %603, %604 : vector<1x256xi1>, vector<1x256xf32>
    %606 = arith.addf %602, %605 : vector<1x256xf32>
    %607 = arith.negf %606 : vector<1x256xf32>
    %608 = math.exp %607 : vector<1x256xf32>
    %cst_99 = arith.constant 1.000000e+00 : f32
    %609 = vector.broadcast %cst_99 : f32 to vector<1x256xf32>
    %610 = arith.addf %609, %608 : vector<1x256xf32>
    %611 = arith.divf %609, %610 : vector<1x256xf32>
    %612 = vector.shape_cast %611 : vector<1x256xf32> to vector<1x1x256xf32>
    %613 = vector.shape_cast %612 : vector<1x1x256xf32> to vector<1x1x256xf32>
    %614 = vector.broadcast %613 : vector<1x1x256xf32> to vector<1x4x256xf32>
    %c0_i32_100 = arith.constant 0 : i32
    %c4_i32_101 = arith.constant 4 : i32
    %615 = arith.muli %c0_i32_100, %c4_i32_101 : i32
    %616 = tpu.assume_multiple %615, 4 : i32
    %c0_102 = arith.constant 0 : index
    %617 = arith.index_cast %616 : i32 to index
    %c0_103 = arith.constant 0 : index
    %618 = vector.load %arg4[%c0_102, %617, %c0_103] : memref<1x4x256xf32, #tpu.memory_space<vmem>>, vector<1x4x256xf32>
    %619 = arith.mulf %618, %614 : vector<1x4x256xf32>
    %c0_104 = arith.constant 0 : index
    %620 = arith.index_cast %616 : i32 to index
    %c0_105 = arith.constant 0 : index
    %621 = vector.load %arg5[%c0_104, %620, %c0_105] : memref<1x4x256xf32, #tpu.memory_space<vmem>>, vector<1x4x256xf32>
    tpu.vector_store %arg5[%c0_104, %620, %c0_105], %619 {strides = array<i32>} : memref<1x4x256xf32, #tpu.memory_space<vmem>>, vector<1x4x256xf32>,
    %c1_i32_106 = arith.constant 1 : i32
    return
  }
  func.func @transform_0(%arg0: i32) -> i32 {
    %c0_i32 = arith.constant 0 : i32
    %c0_i32_0 = arith.constant 0 : i32
    return %c0_i32 : i32
  }
  func.func @transform_1(%arg0: i32) -> (i32, i32) {
    %c0_i32 = arith.constant 0 : i32
    %c0_i32_0 = arith.constant 0 : i32
    %c0_i32_1 = arith.constant 0 : i32
    return %c0_i32, %c0_i32_0 : i32, i32
  }
  func.func @transform_2(%arg0: i32) -> (i32, i32) {
    %c0_i32 = arith.constant 0 : i32
    %c0_i32_0 = arith.constant 0 : i32
    %c0_i32_1 = arith.constant 0 : i32
    return %c0_i32, %c0_i32_0 : i32, i32
  }
  func.func @transform_3(%arg0: i32) -> (i32, i32, i32) {
    %c0_i32 = arith.constant 0 : i32
    %c0_i32_0 = arith.constant 0 : i32
    %c0_i32_1 = arith.constant 0 : i32
    return %arg0, %c0_i32, %c0_i32_0 : i32, i32, i32
  }
  func.func @transform_4(%arg0: i32) -> (i32, i32, i32) {
    %c0_i32 = arith.constant 0 : i32
    %c0_i32_0 = arith.constant 0 : i32
    %c0_i32_1 = arith.constant 0 : i32
    return %arg0, %c0_i32, %c0_i32_0 : i32, i32, i32
  }
}

</mosaic_0001>

<bundles_post_ra>
// kernel: tpu_custom_call.1
= control target key start
LH: loop header
LB: loop body
LE: loop exit
PB: predicated region body
PF: predicated region fallthrough
CT: control target
= control target key end

     0   :  { %s2924_s0 = inlined_call_operand.hbm [shape: f32[98], index: 0, kind: input, shape index: {}]   ;;  %s2925_s1 = inlined_call_operand.hbm [shape: s32[1,256], index: 1, kind: input, shape index: {}]   ;;  %s2926_s2 = inlined_call_operand.vmem [shape: s32[1,256], index: 2, kind: input, shape index: {}]   ;;  %s2927_s3 = inlined_call_operand.hbm [shape: f32[2,4,256], index: 3, kind: input, shape index: {}]   ;;  %s2928_s4 = inlined_call_operand.hbm [shape: f32[2,4,256], index: 4, kind: output, shape index: {}]  }
   0x1   :  { %3020 = sst [smem:[#allocation94_spill]] %s2924_s0 }
   0x2   :  { %3021 = sst [smem:[#allocation95_spill]] %s2925_s1 }
   0x3   :  { %3022 = sst [smem:[#allocation96_spill]] %s2926_s2 }
   0x4   :  { %3023 = sst [smem:[#allocation97_spill]] %s2927_s3 }
   0x5   :  { %3024 = sst [smem:[#allocation98_spill]] %s2928_s4 }
   0x6   :  { %9 = vsyncpa [#allocation5], 0 }
   0x7   :  { %10 = vsyncpa [#allocation3], 0 }
   0x8   :  { %11 = vsyncpa [#allocation8], 0 }
   0x9   :  { %13 = vsyncpa [#allocation8 + $0x1], 0 }
   0xa   :  { %14 = vsyncpa [#allocation4], 0 }
   0xb   :  { %16 = vsyncpa [#allocation4 + $0x1], 0  ;;  %s1820_s15 = smov 0   ;;  %s1822_s16 = smov 0  }
   0xc   :  { %s1824_s17 = smov 0   ;;  %s1826_s18 = smov 0  }
   0xd LB: > { %3025 = sst [smem:[#allocation14_spill]] %s1764_s15  ;;  %s1841_s19 = sadd.s32 4294967295, %s1776_s18   ;;  %s1776_s18 = sphi %s1826_s18, %s3323_s18   ;;  %s1772_s17 = sphi %s1824_s17, %s3326_s17   ;;  %s1768_s16 = sphi %s1822_s16, %s3325_s16   ;;  %s1764_s15 = sphi %s1820_s15, %s3324_s15  }
   0xe   : > { %3026 = sst [smem:[#allocation15_spill]] %s1768_s16  ;;  %s1435_s20 = sadd.s32 4294967294, %s1776_s18  }
   0xf   : > { %3027 = sst [smem:[#allocation16_spill]] %s1772_s17  ;;  %p105_p0 = scmp.ne.s32.totalorder %s1768_s16, %s1764_s15 }
  0x10   : > { %3028 = sst [smem:[#allocation17_spill]] %s1776_s18  ;;  %p2929_p1 = scmp.eq.s32.totalorder %s1841_s19, 0 }
  0x11   : > { %3029 = sst [smem:[#allocation18_spill]] %s1841_s19  ;;  %p129_p2 = scmp.eq.s32.totalorder %s1841_s19, 1 }
  0x12   : > { %p135_p3 = scmp.eq.s32.totalorder %s1435_s20, 1  ;;  %p1850_p4 = por %p2929_p1, %p105_p0 }
  0x13   : > { %p1436_p5 = scmp.ge.s32.totalorder %s1776_s18, 1  ;;  %p142_p7 = scmp.lt.s32.totalorder %s1776_s18, 3 }
  0x14   : > { %s3030_s21 = scalar_select %p1850_p4, 1, 0 }
  0x15   : > { %p1855_p6 = por %p135_p3, %p105_p0  ;;  %p1860_p8 = pnand %p1436_p5, %p142_p7 }
  0x16   : > { %s1778_s24 = smov [#allocation6]   ;;  %s1874_s27 = sadd.s32 1, %s1776_s18  }
  0x17   : > { %s3031_s22 = scalar_select %p1855_p6, 1, 0 }
  0x18   : > { %s3033_s23 = scalar_select %p1860_p8, 1, 0 }
  0x19   : > { %3032 = sst [smem:[#allocation19_spill]] %s3031_s22  ;;  %p1565_p10 = pneg %p1860_p8 }
  0x1a   : > { %s164_s25 = sshll.u32 %s1778_s24, 4  ;;  %3035 = sst [smem:[#allocation20_spill]] %s1874_s27  ;;  %s165_s25 = int_to_ptr.vmem [resolvable:$true] %s164_s25 }
  0x1b   : > { %p1869_p11 = pnand %p1565_p10, %p2929_p1  ;;  %s89_s28 = ssub.s32 %s1776_s18, %s1874_s27 }
  0x1c   : > { %s92_s29 = sadd.s32 1, %s1772_s17  ;;  %p1879_p12 = scmp.eq.s32.totalorder %s89_s28, 0 }
  0x1d   : > { %s1779_s5 = smov [#allocation2]   ;;  %s3037_s0 = sld [smem:[#allocation94_spill]] }
  0x1e   : > { %p1652_p13 = pneg %p1869_p11  ;;  %s1661_s8 = scalar_lea.vmem %s165_s25, 32 }
  0x1f   : > { %p1662_p0 = scmp.ne.s32.totalorder %s165_s25, %s1661_s8  ;;  %p1669_p7 = scmp.lt.s32.totalorder %s165_s25, %s165_s25 }
  0x20   : > { %p1670_p10 = scmp.lt.s32.totalorder %s1661_s8, %s1661_s8 }
  0x21   : > { %p1664_p3 = pnand %p1662_p0, %p1652_p13 }
  0x22   : > { %p1671_p9 = por %p1670_p10, %p1669_p7 }
  0x23   : > { %1568 = dma.hbm_to_smem (!%p1869_p11), %s3037_s0, 16, %s1779_s5, [#allocation5]  }
  0x24   : > { %p1665_p5 = pneg %p1664_p3 }
  0x26   : > { %p1672_p1 = pnand %p1671_p9, %p1665_p5 }
  0x28   : > { %1675 = shalt.err (!%p1672_p1)
}
  0x29   : > { %s3038_s1 = sld [smem:[#allocation95_spill]]  ;;  %p99_p9 = scmp.ne.s32.totalorder %s1772_s17, %s1768_s16 }
  0x2a   : > { %s1898_s11 = scalar_select %p1879_p12, %s1772_s17, %s92_s29  }
  0x2b   : > { %p100_p1 = scmp.eq.s32.totalorder %s1776_s18, 0  ;;  %p1582_p13 = scmp.lt.s32.totalorder %s1776_s18, 2 }
  0x2c   : > { %3039 = sst [smem:[#allocation21_spill]] %s1898_s11  ;;  %s178_s12 = sand.u32 1, %s1772_s17  }
  0x2d   : > { %p101_p0 = por %p100_p1, %p99_p9  ;;  %p1907_p3 = por %p129_p2, %p99_p9 }
  0x2e   : > { %s1440_s14 = sshll.u32 %s178_s12, 3  ;;  %s1551_s20 = sshll.u32 %s1776_s18, 7 }
  0x2f   : > { %1571 = dma.hbm_to_vmem [thread:$0]  (!%p1869_p11), %s3038_s1, 32, %s165_s25, [#allocation3]  }
  0x30   : > { %s3040_s13 = scalar_select %p1907_p3, 1, 0 }
  0x31   : > { %s3042_s3 = sld [smem:[#allocation97_spill]]  ;;  %s182_s25 = scalar_lea.vmem [#allocation7], %s1440_s14 }
  0x32   : > { %3041 = sst [smem:[#allocation22_spill]] %s3040_s13  ;;  %s190_s29 = sshll.u32 %s182_s25, 4  ;;  %s191_s29 = int_to_ptr.vmem [resolvable:$true] %s190_s29 }
  0x33   : > { %p1917_p11 = pnand %p1582_p13, %p101_p0  ;;  %s179_s5 = scalar_lea.sflag [#allocation8], %s178_s12 }
  0x35   : > { %p1678_p12 = pneg %p1917_p11 }
  0x37   : > { %s1915_s28 = scalar_lea.hbm %s3042_s3, %s1551_s20  ;;  %s1681_s9 = scalar_lea.hbm %s3042_s3, 256 }
  0x38   : > { %s1676_s6 = scalar_lea.hbm %s1915_s28, 128  ;;  %p1682_p10 = scmp.lt.s32.totalorder %s1915_s28, %s3042_s3 }
  0x39   : > { %p1677_p2 = scmp.ne.s32.totalorder %s1915_s28, %s1676_s6  ;;  %p1683_p9 = scmp.lt.s32.totalorder %s1681_s9, %s1676_s6 }
  0x3b   : > { %p1679_p5 = pnand %p1678_p12, %p1677_p2  ;;  %p1684_p1 = por %p1683_p9, %p1682_p10 }
  0x3d   : > { %p1680_p7 = pneg %p1679_p5 }
  0x3f   : > { %p1685_p13 = pnand %p1684_p1, %p1680_p7 }
  0x41   : > { %1688 = shalt.err (!%p1685_p13)
}
  0x42   : > { %s1689_s20 = scalar_lea.vmem %s191_s29, 128  ;;  %s1780_s12 = smov [#allocation7]  }
  0x43   : > { %p1690_p0 = scmp.ne.s32.totalorder %s191_s29, %s1689_s20  ;;  %s1694_s24 = sshll.u32 %s1780_s12, 4  ;;  %s1695_s24 = int_to_ptr.vmem [resolvable:$false] %s1694_s24 }
  0x44   : > { %s1696_s26 = scalar_lea.vmem %s1695_s24, 256  ;;  %p1697_p2 = scmp.lt.s32.totalorder %s191_s29, %s1695_s24 }
  0x45   : > { %p1692_p6 = pnand %p1690_p0, %p1678_p12  ;;  %p1698_p5 = scmp.lt.s32.totalorder %s1696_s26, %s1689_s20 }
  0x47   : > { %p1693_p3 = pneg %p1692_p6  ;;  %p1699_p4 = por %p1698_p5, %p1697_p2 }
  0x49   : > { %p1700_p8 = pnand %p1699_p4, %p1693_p3 }
  0x4b   : > { %1703 = shalt.err (!%p1700_p8)
}
  0x4c   : > { %1575 = dma.hbm_to_vmem [thread:$0]  (!%p1917_p11), %s1915_s28, 128, %s191_s29, %s179_s5  }
  0x4d   : > { %p3044_p7 = scmp.ne.s32.totalorder %s3033_s23, 0 }
  0x4f   : > { %199 = sbr.rel (%p3044_p7) target bundleno = 533 (0x215), region = 36 }
  0x54   : > { %p3045_p10 = scmp.eq.s32.totalorder %s1841_s19, 0 }
  0x56   : > { %1747 = dma.done.wait (%p3045_p10), [#allocation5], 16   ;;  %p3046_p6 = pmov %p3045_p10 }
  0x58   : > { %1749 = vsyncadd (%p3046_p6), [#allocation5], 4294967280  ;;  %p3047_p12 = pmov %p3046_p6 }
  0x59   : > { %p3048_p9 = pmov %p3046_p6 }
  0x5a   : > { %1751 = dma.done.wait (%p3047_p12), [#allocation3], 32  }
  0x5b   : > { %1753 = vsyncadd (%p3048_p9), [#allocation3], 4294967264  ;;  %s1946_s25 = sand.u32 1, %s1768_s16   ;;  %p3051_p4 = scmp.ne.s32.totalorder %s3030_s21, 0 }
  0x5c   : > { %3049 = sst [smem:[#allocation23_spill]] %s1946_s25  ;;  %s2933_s23 = sshll.u32 %s1946_s25, 3 }
  0x5d   : > { %s210_s28 = scalar_lea.sflag [#allocation8], %s1946_s25  ;;  %s1952_s29 = scalar_lea.vmem [#allocation7], %s2933_s23 }
  0x5e   : > { %3050 = sst [smem:[#allocation24_spill]] %s1952_s29 }
  0x5f   : > { %1755 = dma.done.wait (%p3051_p4), %s210_s28, 128  }
  0x60   : > { %1757 = vsyncadd (%p3051_p4), %s210_s28, 4294967168 }
  0x61   : > { %218 = sfence }
  0x62   : > { %v298_v0 = vld [vmem:[%s1952_s29] sm:$0xff]  ;;  %vm303_vm0 = vcmask 1043456   ;;  %s1781_s21 = smov 32   ;;  %s1782_s30 = smov 48   ;;  %v1787_v34 = vmov 1966171168   ;;  %v341_v36 = vlaneseq }
  0x63   : > { %v321_v1 = vsel %vm303_vm0, %v298_v0, -inf  ;;  %v304_v2 = vsel %vm303_vm0, %v298_v0, 0.0  ;;  %v301_v3 = vcombine.high %v298_v0, %v298_v0  ;;  %s1783_s5 = smov 16   ;;  %s1784_s6 = smov 112   ;;  %v356_v35 = vunpack.c.l.s4 %v1787_v34  ;;  %v2121_v39 = vld [vmem:[#allocation6] sm:$0x3] }
  0x64   : > { %v322_v4 = vrot.slane %v321_v1, 4  ;;  %v305_v5 = vrot.slane %v304_v2, 4  ;;  %s1785_s7 = smov 96   ;;  %s1989_s8 = sld [smem:[#allocation2 + $0x31]]  ;;  %v2117_v38 = vshrl.u32 %v341_v36, 7  ;;  %v2127_v40 = vand.u32 127, %v341_v36 }
  0x65   : > { %v328_v6 = vsel %vm303_vm0, %v301_v3, -inf  ;;  %v311_v7 = vsel %vm303_vm0, %v301_v3, 0.0  ;;  %s1991_s9 = sld [smem:[#allocation2 + $0x32]]  ;;  %s1786_s24 = smov 80   ;;  %v357_v37 = vunpack.c.0.s8 %v356_v35  ;;  %v2137_v44 = vadd.s32 4294967293, %v2121_v39 }
  0x66   : > { %v323_v8 = vmax.f32 %v321_v1, %v322_v4  ;;  %v306_v9 = vadd.f32 %v305_v5, %v304_v2  ;;  %v329_v10 = vrot.slane %v328_v6, 4  ;;  %v312_v11 = vrot.slane %v311_v7, 4  ;;  %s1995_s10 = sld [smem:[#allocation2 + $0x33]] }
  0x67   : > { %s1997_s14 = sld [smem:[#allocation2 + $0x34]]  ;;  %v2132_v41 = vsub.s32 %v357_v37, %v2117_v38  ;;  %v2145_v48 = vadd.s32 4294967294, %v2121_v39  ;;  %vm265_vm1 = vcmp.ge.s32.totalorder %v2121_v39, 0  ;;  %vm266_vm2 = vcmp.lt.s32.totalorder %v2121_v39, 16 }
  0x68   : > { %v324_v12 = vrot.slane %v323_v8, 2  ;;  %v307_v13 = vrot.slane %v306_v9, 2  ;;  %v330_v14 = vmax.f32 %v328_v6, %v329_v10  ;;  %v313_v15 = vadd.f32 %v312_v11, %v311_v7  ;;  %s1999_s20 = sld [smem:[#allocation2 + $0x35]]  ;;  %vm2194_vm3 = vmand %vm265_vm1, %vm266_vm2 }
  0x69   : > { %s2001_s12 = sld [smem:[#allocation2 + $0x36]]  ;;  %v2177_v62 = vadd.s32 4294967295, %v2121_v39  ;;  %vm343_vm4 = vcmp.lt.s32.totalorder %v2127_v40, 48  ;;  %vm450_vm5 = vcmp.lt.s32.totalorder %v2127_v40, 32  ;;  %v2253_v35 = vadd.s32 3, %v2121_v39 }
  0x6a   : > { %v325_v16 = vmax.f32 %v323_v8, %v324_v12  ;;  %v308_v17 = vadd.f32 %v307_v13, %v306_v9  ;;  %v331_v18 = vrot.slane %v330_v14, 2  ;;  %v314_v19 = vrot.slane %v313_v15, 2  ;;  %3052 = sst [smem:[#allocation25_spill]] %s1989_s8 }
  0x6b   : > { %3053 = sst [smem:[#allocation26_spill]] %s1991_s9  ;;  %v395_v42 = vstv %s1989_s8  ;;  %v403_v43 = vstv %s1991_s9  ;;  %vm242_vm6 = vcmp.ge.s32.totalorder %v2137_v44, 0  ;;  %vm243_vm7 = vcmp.lt.s32.totalorder %v2137_v44, 16 }
  0x6c   : > { %v326_v20 = vrot.slane %v325_v16, 1  ;;  %v309_v21 = vrot.slane %v308_v17, 1  ;;  %v332_v22 = vmax.f32 %v330_v14, %v331_v18  ;;  %v315_v23 = vadd.f32 %v314_v19, %v313_v15  ;;  %3054 = sst [smem:[#allocation27_spill]] %s1995_s10  ;;  %vm2395_vm13 = vmand %vm242_vm6, %vm243_vm7 }
  0x6d   : > { %3055 = sst [smem:[#allocation28_spill]] %s1997_s14  ;;  %v411_v45 = vstv %s1995_s10  ;;  %v419_v46 = vstv %s1997_s14  ;;  %v2212_v15 = vadd.s32 1, %v2121_v39  ;;  %vm250_vm8 = vcmp.ge.s32.totalorder %v2145_v48, 0 }
  0x6e   : > { %v1959_v24 = vmax.f32 %v325_v16, %v326_v20  ;;  %v310_v25 = vadd.f32 %v309_v21, %v308_v17  ;;  %v333_v26 = vrot.slane %v332_v22, 1  ;;  %v316_v29 = vrot.slane %v315_v23, 1  ;;  %3056 = sst [smem:[#allocation29_spill]] %s1999_s20 }
  0x6f   : > { %3057 = sst [smem:[#allocation30_spill]] %s2001_s12  ;;  %v427_v47 = vstv %s1999_s20  ;;  %v435_v49 = vstv %s2001_s12  ;;  %vm251_vm9 = vcmp.lt.s32.totalorder %v2145_v48, 16  ;;  %vm557_vm10 = vcmp.lt.s32.totalorder %v2127_v40, 16 }
  0x70   : > { %453 = vrot.lane.b32.xlu0 %v1959_v24, %s1781_s21  ;;  %346 = vrot.lane.b32.xlu1 %v1959_v24, %s1782_s30  ;;  %v1963_v27 = vmul.f32 0.25, %v310_v25  ;;  %v1965_v28 = vmax.f32 %v332_v22, %v333_v26  ;;  %v317_v30 = vadd.f32 %v316_v29, %v315_v23  ;;  %s2005_s26 = sld [smem:[#allocation2 + $0x37]]  ;;  %vm258_vm11 = vcmp.ge.s32.totalorder %v2177_v62, 0  ;;  %vm2416_vm15 = vmand %vm250_vm8, %vm251_vm9 }
  0x71   : > { %s2007_s28 = sld [smem:[#allocation2 + $0x38]]  ;;  %vm259_vm12 = vcmp.lt.s32.totalorder %v2177_v62, 16  ;;  %vm758_vm14 = vcmp.lt.s32.totalorder %v2127_v40, 112  ;;  %vm272_vm1 = vcmp.ge.s32.totalorder %v2212_v15, 0  ;;  %vm273_vm2 = vcmp.lt.s32.totalorder %v2212_v15, 16 }
  0x72   : > { %v1971_v31 = vmul.f32 0.25, %v317_v30  ;;  %v681_v33 = vcombine.low %v1959_v24, %v1965_v28  ;;  %s2021_s23 = sld [smem:[#allocation2 + $0x3e]]  ;;  %vm2489_vm0 = vmand %vm258_vm11, %vm259_vm12  ;;  %vm288_vm8 = vcmp.ge.s32.totalorder %v2253_v35, 0  ;;  %vm289_vm9 = vcmp.lt.s32.totalorder %v2253_v35, 16 }
  0x73   : > { %s2023_s0 = sld [smem:[#allocation2 + $0x7]]  ;;  %vm2589_vm7 = vmand %vm272_vm1, %vm273_vm2  ;;  %vm1090_vm12 = vcmp.lt.s32.totalorder %v2127_v40, 3 }
  0x74   : > { %337 = vrot.lane.b32.xlu0 %v1963_v27, %s1782_s30  ;;  %348 = vrot.lane.b32.xlu1 %v1965_v28, %s1782_s30  ;;  %v662_v32 = vcombine.low %v1963_v27, %v1971_v31  ;;  %s2025_s1 = sld [smem:[#allocation2 + $0x8]]  ;;  %v688_v56 = vrot.slane %v681_v33, %v2132_v41  ;;  %vm2669_vm11 = vmand %vm288_vm8, %vm289_vm9  ;;  %vm1244_vm9 = vcmp.lt.s32.totalorder %v2127_v40, 126 }
  0x75   : > { %s2027_s3 = sld [smem:[#allocation2 + $0x9]] }
  0x76   : > { %3058 = sst [smem:[#allocation31_spill]] %s2005_s26  ;;  %v443_v50 = vstv %s2005_s26  ;;  %v669_v52 = vrot.slane %v662_v32, %v2132_v41  ;;  %v695_v7 = vrot.slane %v688_v56, %v2132_v41 }
  0x77   : > { %3059 = sst [smem:[#allocation32_spill]] %s2007_s28  ;;  %v502_v51 = vstv %s2007_s28 }
  0x78   : > { %446 = vrot.lane.b32.xlu0 %v1963_v27, %s1781_s21  ;;  %455 = vrot.lane.b32.xlu1 %v1965_v28, %s1781_s21  ;;  %3065 = sst [smem:[#allocation38_spill]] %s2021_s23  ;;  %v550_v59 = vstv %s2021_s23  ;;  %v676_v2 = vrot.slane %v669_v52, %v2132_v41  ;;  %v2230_v23 = vsel %vm2194_vm3, %v695_v7, 0.0 }
  0x79   : > { %3066 = sst [smem:[#allocation39_spill]] %s2023_s0  ;;  %v499_v60 = vstv %s2023_s0 }
  0x7a   : > { %3067 = sst [smem:[#allocation40_spill]] %s2025_s1  ;;  %v507_v61 = vstv %s2025_s1  ;;  %v2221_v19 = vsel %vm2194_vm3, %v676_v2, 0.0  ;;  %v2287_v2 = vsub.s32 1, %v2117_v38  ;;  %vm865_vm3 = vcmp.lt.s32.totalorder %v2127_v40, 96 }
  0x7b   : > { %3068 = sst [smem:[#allocation41_spill]] %s2027_s3  ;;  %v515_v63 = vstv %s2027_s3 }
  0x7c   : > { %553 = vrot.lane.b32.xlu0 %v1963_v27, %s1783_s5  ;;  %448 = vrot.lane.b32.xlu1 %v1971_v31, %s1781_s21  ;;  %s2009_s21 = sld [smem:[#allocation2 + $0x39]]  ;;  %3150 = vst [vmem:[#allocation86_spill] sm:$0xff] %v2287_v2 }
  0x7d   : > { %s2029_s11 = sld [smem:[#allocation2 + $0xa]] }
  0x7e   : > { %s2031_s17 = sld [smem:[#allocation2 + $0xb]] }
  0x7f   : > { %s2033_s16 = sld [smem:[#allocation2 + $0xc]] }
  0x80   : > { %555 = vrot.lane.b32.xlu1 %v1971_v31, %s1783_s5  ;;  %339 = vrot.lane.b32.xlu0 %v1971_v31, %s1782_s30  ;;  %s2011_s30 = sld [smem:[#allocation2 + $0x3a]] }
  0x81   : > { %s2037_s27 = sld [smem:[#allocation2 + $0xe]] }
  0x82   : > { %3060 = sst [smem:[#allocation33_spill]] %s2009_s21  ;;  %v510_v53 = vstv %s2009_s21 }
  0x83   : > { %3069 = sst [smem:[#allocation42_spill]] %s2029_s11  ;;  %v523_v0 = vstv %s2029_s11 }
  0x84   : > { %562 = vrot.lane.b32.xlu1 %v1965_v28, %s1783_s5  ;;  %560 = vrot.lane.b32.xlu0 %v1959_v24, %s1783_s5  ;;  %s2015_s5 = sld [smem:[#allocation2 + $0x3b]]  ;;  %v531_v1 = vstv %s2031_s17 }
  0x85   : > { %3070 = sst [smem:[#allocation43_spill]] %s2031_s17 }
  0x86   : > { %3061 = sst [smem:[#allocation34_spill]] %s2011_s30  ;;  %v518_v54 = vstv %s2011_s30 }
  0x87   : > { %3071 = sst [smem:[#allocation44_spill]] %s2033_s16 }
  0x88   : > { %756 = vrot.lane.b32.xlu1 %v1971_v31, %s1784_s6  ;;  %754 = vrot.lane.b32.xlu0 %v1963_v27, %s1784_s6  ;;  %3073 = sst [smem:[#allocation46_spill]] %s2037_s27 }
  0x89   : > { %s2039_s18 = sld [smem:[#allocation2 + $0xf]] }
  0x8a   : > { %3062 = sst [smem:[#allocation35_spill]] %s2015_s5  ;;  %v526_v55 = vstv %s2015_s5 }
  0x8b   : > { %s2041_s22 = sld [smem:[#allocation2 + $0x10]] }
  0x8c   : > { %763 = vrot.lane.b32.xlu1 %v1965_v28, %s1784_s6  ;;  %761 = vrot.lane.b32.xlu0 %v1959_v24, %s1784_s6  ;;  %s2017_s6 = sld [smem:[#allocation2 + $0x3c]] }
  0x8d   : > { %s2043_s15 = sld [smem:[#allocation2 + $0x11]] }
  0x8e   : > { %s2045_s4 = sld [smem:[#allocation2 + $0x12]] }
  0x8f   : > { %3074 = sst [smem:[#allocation47_spill]] %s2039_s18 }
  0x90   : > { %863 = vrot.lane.b32.xlu1 %v1971_v31, %s1785_s7  ;;  %861 = vrot.lane.b32.xlu0 %v1963_v27, %s1785_s7  ;;  %s2047_s13 = sld [smem:[#allocation2 + $0x13]] }
  0x91   : > { %3075 = sst [smem:[#allocation48_spill]] %s2041_s22 }
  0x92   : > { %3063 = sst [smem:[#allocation36_spill]] %s2017_s6  ;;  %v534_v57 = vstv %s2017_s6 }
  0x93   : > { %3076 = sst [smem:[#allocation49_spill]] %s2043_s15 }
  0x94   : > { %870 = vrot.lane.b32.xlu1 %v1965_v28, %s1785_s7  ;;  %868 = vrot.lane.b32.xlu0 %v1959_v24, %s1785_s7  ;;  %s2019_s7 = sld [smem:[#allocation2 + $0x3d]] }
  0x95   : > { %3077 = sst [smem:[#allocation50_spill]] %s2045_s4 }
  0x96   : > { %3078 = sst [smem:[#allocation51_spill]] %s2047_s13 }
  0x97   : > { %s2049_s29 = sld [smem:[#allocation2 + $0x14]] }
  0x98   : > { %970 = vrot.lane.b32.xlu1 %v1971_v31, %s1786_s24  ;;  %968 = vrot.lane.b32.xlu0 %v1963_v27, %s1786_s24  ;;  %s2051_s25 = sld [smem:[#allocation2]]  ;;  %v2238_v27 = vadd.s32 2, %v2121_v39 }
  0x99   : > { %s2053_s19 = sld [smem:[#allocation2 + $0x1]] }
  0x9a   : > { %3064 = sst [smem:[#allocation37_spill]] %s2019_s7  ;;  %v542_v58 = vstv %s2019_s7  ;;  %vm281_vm6 = vcmp.lt.s32.totalorder %v2238_v27, 16 }
  0x9b   : > { %s2055_s2 = sld [smem:[#allocation2 + $0x2]] }
  0x9c   : > { %977 = vrot.lane.b32.xlu1 %v1965_v28, %s1786_s24  ;;  %975 = vrot.lane.b32.xlu0 %v1959_v24, %s1786_s24  ;;  %s2035_s24 = sld [smem:[#allocation2 + $0xd]] }
  0x9d   : > { %3079 = sst [smem:[#allocation52_spill]] %s2049_s29 }
  0x9e   : > { %3080 = sst [smem:[#allocation53_spill]] %s2051_s25 }
  0x9f   : > { %3081 = sst [smem:[#allocation54_spill]] %s2053_s19 }
  0xa0   : > { %s2059_s27 = sld [smem:[#allocation2 + $0x4]] }
  0xa1   : > { %3082 = sst [smem:[#allocation55_spill]] %s2055_s2 }
  0xa2   : > { %3072 = sst [smem:[#allocation45_spill]] %s2035_s24 }
  0xa3   : > { %s2057_s24 = sld [smem:[#allocation2 + $0x3]] }
  0xa4   : > { %s2061_s18 = sld [smem:[#allocation2 + $0x5]] }
  0xa5   : > { %s2063_s22 = sld [smem:[#allocation2 + $0x6]] }
  0xa6   : > { %3084 = sst [smem:[#allocation57_spill]] %s2059_s27 }
  0xa7   : > { %s2065_s15 = sld [smem:[#allocation2 + $0x3f]] }
  0xa8   : > { %s2067_s4 = sld [smem:[#allocation2 + $0x40]] }
  0xa9   : > { %3083 = sst [smem:[#allocation56_spill]] %s2057_s24 }
  0xaa   : > { %3085 = sst [smem:[#allocation58_spill]] %s2061_s18 }
  0xab   : > { %3086 = sst [smem:[#allocation59_spill]] %s2063_s22 }
  0xac   : > { %s2069_s13 = sld [smem:[#allocation2 + $0x41]] }
  0xad   : > { %3087 = sst [smem:[#allocation60_spill]] %s2065_s15 }
  0xae   : > { %3088 = sst [smem:[#allocation61_spill]] %s2067_s4 }
  0xaf   : > { %s2071_s29 = sld [smem:[#allocation2 + $0x42]] }
  0xb0   : > { %s2073_s25 = sld [smem:[#allocation2 + $0x43]] }
  0xb1   : > { %s2075_s19 = sld [smem:[#allocation2 + $0x44]] }
  0xb2   : > { %3089 = sst [smem:[#allocation62_spill]] %s2069_s13 }
  0xb3   : > { %s2077_s2 = sld [smem:[#allocation2 + $0x45]] }
  0xb4   : > { %s2079_s24 = sld [smem:[#allocation2 + $0x18]] }
  0xb5   : > { %3090 = sst [smem:[#allocation63_spill]] %s2071_s29 }
  0xb6   : > { %3091 = sst [smem:[#allocation64_spill]] %s2073_s25 }
  0xb7   : > { %3092 = sst [smem:[#allocation65_spill]] %s2075_s19 }
  0xb8   : > { %s2081_s27 = sld [smem:[#allocation2 + $0x49]] }
  0xb9   : > { %3093 = sst [smem:[#allocation66_spill]] %s2077_s2 }
  0xba   : > { %3094 = sst [smem:[#allocation67_spill]] %s2079_s24 }
  0xbb   : > { %s2083_s18 = sld [smem:[#allocation2 + $0x1f]] }
  0xbc   : > { %s2085_s22 = sld [smem:[#allocation2 + $0x50]] }
  0xbd   : > { %s2087_s15 = sld [smem:[#allocation2 + $0x26]] }
  0xbe   : > { %3095 = sst [smem:[#allocation68_spill]] %s2081_s27 }
  0xbf   : > { %s2089_s4 = sld [smem:[#allocation2 + $0x15]] }
  0xc0   : > { %s2091_s13 = sld [smem:[#allocation2 + $0x46]] }
  0xc1   : > { %3096 = sst [smem:[#allocation69_spill]] %s2083_s18 }
  0xc2   : > { %3097 = sst [smem:[#allocation70_spill]] %s2085_s22 }
  0xc3   : > { %3098 = sst [smem:[#allocation71_spill]] %s2087_s15 }
  0xc4   : > { %s2093_s29 = sld [smem:[#allocation2 + $0x1c]] }
  0xc5   : > { %s2095_s25 = sld [smem:[#allocation2 + $0x4d]]  ;;  %v700_v30 = vstv %s2089_s4 }
  0xc6   : > { %s2097_s19 = sld [smem:[#allocation2 + $0x23]]  ;;  %v703_v31 = vstv %s2091_s13  ;;  %v2270_v34 = vmul.f32 %v700_v30, %v2221_v19 }
  0xc7   : > { %s2099_s2 = sld [smem:[#allocation2 + $0x54]]  ;;  %v2273_v33 = vmul.f32 %v703_v31, %v2230_v23 }
  0xc8   : > { %s2101_s24 = sld [smem:[#allocation2 + $0x2a]] }
  0xc9   : > { %s2103_s27 = sld [smem:[#allocation2 + $0x5b]] }
  0xca   : > { %3099 = sst [smem:[#allocation72_spill]] %s2093_s29 }
  0xcb   : > { %s2105_s18 = sld [smem:[#allocation2 + $0x16]] }
  0xcc   : > { %3100 = sst [smem:[#allocation73_spill]] %s2097_s19 }
  0xcd   : > { %3101 = sst [smem:[#allocation74_spill]] %s2099_s2 }
  0xce   : > { %3102 = sst [smem:[#allocation75_spill]] %s2101_s24 }
  0xcf   : > { %3103 = sst [smem:[#allocation76_spill]] %s2103_s27 }
  0xd0   : > { %s2107_s22 = sld [smem:[#allocation2 + $0x47]] }
  0xd1   : > { %s2109_s15 = sld [smem:[#allocation2 + $0x1d]]  ;;  %v708_v29 = vstv %s2105_s18 }
  0xd2   : > { %s2111_s29 = sld [smem:[#allocation2 + $0x4e]]  ;;  %v2306_v32 = vmul.f32 %v708_v29, %v2221_v19 }
  0xd3   : > { %s2113_s19 = sld [smem:[#allocation2 + $0x24]] }
  0xd4   : > { %s2115_s24 = sld [smem:[#allocation2 + $0x55]] }
  0xd5   : > { %s2119_s27 = sld [smem:[#allocation2 + $0x2b]] }
  0xd6   : > { %s2156_s10 = sld [smem:[#allocation2 + $0x25]] }
  0xd7   : > { %3104 = sst [smem:[#allocation77_spill]] %s2109_s15 }
  0xd8   : > { %3105 = sst [smem:[#allocation78_spill]] %s2111_s29 }
  0xd9   : > { %3106 = sst [smem:[#allocation79_spill]] %s2113_s19 }
  0xda   : > { %3107 = sst [smem:[#allocation80_spill]] %s2115_s24 }
  0xdb   : > { %3108 = sst [smem:[#allocation81_spill]] %s2119_s27 }
  0xdc   : > { %s2123_s15 = sld [smem:[#allocation2 + $0x5c]] }
  0xdd   : > { %s2125_s29 = sld [smem:[#allocation2 + $0x17]] }
  0xde   : > { %s2129_s19 = sld [smem:[#allocation2 + $0x48]] }
  0xdf   : > { %s2139_s27 = sld [smem:[#allocation2 + $0x1e]] }
  0xe0   : > { %s2165_s26 = sld [smem:[#allocation2 + $0x56]] }
  0xe1   : > { %s2171_s21 = sld [smem:[#allocation2 + $0x2c]] }
  0xe2   : > { %3109 = sst [smem:[#allocation82_spill]] %s2123_s15  ;;  %v454_v36 = vpop.permute.xlu0 %453  ;;  %v347_v37 = vpop.permute.xlu1 %346 }
  0xe3   : > { %s2147_s15 = sld [smem:[#allocation2 + $0x4f]]  ;;  %v716_v28 = vstv %s2125_s29 }
  0xe4   : > { %s2179_s6 = sld [smem:[#allocation2 + $0x5d]]  ;;  %v719_v7 = vstv %s2129_s19 }
  0xe5   : > { %s3121_s8 = sld [smem:[#allocation53_spill]] }
  0xe6   : > { %3110 = sst [smem:[#allocation83_spill]] %s2165_s26  ;;  %v2291_v30 = vpop.permute.xlu0 %337  ;;  %v349_v31 = vpop.permute.xlu1 %348 }
  0xe7   : > { %3113 = sst [smem:[#allocation84_spill]] %s2171_s21  ;;  %v350_v39 = vsel %vm343_vm4, %v347_v37, %v349_v31  ;;  %v351_v24 = vsel %vm343_vm4, %v349_v31, %v347_v37  ;;  %v2327_v31 = vmul.f32 %v719_v7, %v2230_v23 }
  0xe8   : > { %s2185_s23 = sld [smem:[#allocation2 + $0x19]] }
  0xe9   : > { %s3122_s1 = sld [smem:[#allocation54_spill]] }
  0xea   : > { %3118 = sst [smem:[#allocation85_spill]] %s2179_s6  ;;  %v447_v22 = vpop.permute.xlu0 %446  ;;  %v456_v21 = vpop.permute.xlu1 %455 }
  0xeb   : > { %s3126_s17 = sld [smem:[#allocation56_spill]]  ;;  %v392_v14 = vstv %s3121_s8 }
  0xec   : > { %s2199_s11 = sld [smem:[#allocation2 + $0x4a]] }
  0xed   : > { %s2205_s16 = sld [smem:[#allocation2 + $0x20]] }
  0xee   : > { %s3130_s6 = sld [smem:[#allocation60_spill]]  ;;  %v732_v37 = vstv %s2185_s23 }
  0xef   : > { %s3131_s21 = sld [smem:[#allocation67_spill]]  ;;  %v400_v16 = vstv %s3122_s1  ;;  %v2354_v9 = vmul.f32 %v732_v37, %v2221_v19 }
  0xf0   : > { %s3132_s26 = sld [smem:[#allocation68_spill]] }
  0xf1   : > { %s2214_s5 = sld [smem:[#allocation2 + $0x51]]  ;;  %v416_v18 = vstv %s3126_s17 }
  0xf2   : > { %s2223_s7 = sld [smem:[#allocation2 + $0x27]]  ;;  %v735_v7 = vstv %s2199_s11 }
  0xf3   : > { %s3136_s9 = sld [smem:[#allocation63_spill]] }
  0xf4   : > { %s2232_s0 = sld [smem:[#allocation2 + $0x58]] }
  0xf5   : > { %v724_v25 = vstv %s3131_s21  ;;  %s2240_s8 = sld [smem:[#allocation2 + $0x2e]] }
  0xf6   : > { %v727_v26 = vstv %s3132_s26  ;;  %s3145_s26 = sld [smem:[#allocation72_spill]]  ;;  %v2259_v56 = vmul.f32 %v724_v25, %v2221_v19  ;;  %v2295_v25 = vsub.s32 0, %v2117_v38  ;;  %v373_v38 = vcombine.low %v351_v24, %v350_v39 }
  0xf7   : > { %s2255_s21 = sld [smem:[#allocation2 + $0x1a]]  ;;  %v2263_v6 = vmul.f32 %v727_v26, %v2230_v23  ;;  %v711_v26 = vstv %s2107_s22  ;;  %v457_v24 = vsel %vm450_vm5, %v454_v36, %v456_v21  ;;  %v458_v39 = vsel %vm450_vm5, %v456_v21, %v454_v36 }
  0xf8   : > { %3135 = sst [smem:[#allocation60_spill]] %s2223_s7  ;;  %3155 = vst [vmem:[#allocation87_spill] sm:$0xff] %v2295_v25  ;;  %v2309_v52 = vmul.f32 %v711_v26, %v2230_v23  ;;  %v2324_v26 = vmul.f32 %v716_v28, %v2221_v19  ;;  %v480_v13 = vcombine.low %v458_v39, %v457_v24  ;;  %v2357_v21 = vmul.f32 %v735_v7, %v2230_v23  ;;  %v554_v39 = vpop.permute.xlu0 %553  ;;  %v449_v28 = vpop.permute.xlu1 %448 }
  0xf9   : > { %s2247_s7 = sld [smem:[#allocation2 + $0x5f]]  ;;  %v380_v24 = vrot.slane %v373_v38, %v2132_v41  ;;  %v451_v37 = vsel %vm450_vm5, %v447_v22, %v449_v28  ;;  %v3228_v25 = vstv %s3136_s9 }
  0xfa   : > { %s3146_s20 = sld [smem:[#allocation73_spill]]  ;;  %3167 = vst [vmem:[#allocation88_spill] sm:$0xff] %v2357_v21  ;;  %v487_v38 = vrot.slane %v480_v13, %v2132_v41 }
  0xfb   : > { %3140 = sst [smem:[#allocation67_spill]] %s2240_s8 }
  0xfc   : > { %s2265_s13 = sld [smem:[#allocation2 + $0x4b]]  ;;  %v556_v8 = vpop.permute.xlu1 %555  ;;  %v340_v5 = vpop.permute.xlu0 %339 }
  0xfd   : > { %s2275_s17 = sld [smem:[#allocation2 + $0x21]]  ;;  %v740_v11 = vstv %s2255_s21 }
  0xfe   : > { %s2281_s14 = sld [smem:[#allocation2 + $0x52]]  ;;  %v2370_v7 = vmul.f32 %v740_v11, %v2221_v19  ;;  %v452_v11 = vsel %vm450_vm5, %v449_v28, %v447_v22  ;;  %vm280_vm5 = vcmp.ge.s32.totalorder %v2238_v27, 0 }
  0xff   : > { %3144 = sst [smem:[#allocation68_spill]] %s2247_s7  ;;  %v461_v10 = vcombine.low %v452_v11, %v451_v37  ;;  %v494_v37 = vrot.slane %v487_v38, %v2132_v41 }
 0x100   : > { %s3151_s3 = sld [smem:[#allocation77_spill]]  ;;  %3168 = vst [vmem:[#allocation89_spill] sm:$0xff] %v2370_v7  ;;  %v561_v3 = vpop.permute.xlu0 %560 }
 0x101   : > { %s2289_s12 = sld [smem:[#allocation2 + $0x28]]  ;;  %v468_v11 = vrot.slane %v461_v10, %v2132_v41  ;;  %v344_v10 = vsel %vm343_vm4, %v2291_v30, %v340_v5 }
 0x102   : > { %s2299_s4 = sld [smem:[#allocation2 + $0x59]]  ;;  %v743_v36 = vstv %s2265_s13 }
 0x103   : > { %s2311_s1 = sld [smem:[#allocation2 + $0x1b]]  ;;  %v2376_v20 = vmul.f32 %v743_v36, %v2230_v23  ;;  %v387_v36 = vrot.slane %v380_v24, %v2132_v41 }
 0x104   : > { %3149 = sst [smem:[#allocation63_spill]] %s2281_s14 }
 0x105   : > { %s2319_s19 = sld [smem:[#allocation2 + $0x4c]]  ;;  %3170 = vst [vmem:[#allocation90_spill] sm:$0xff] %v2376_v20  ;;  %v389_v48 = vsel %vm2395_vm13, %v387_v36, 0.0 }
 0x106   : > { %s2329_s29 = sld [smem:[#allocation2 + $0x2f]]  ;;  %v404_v28 = vmul.f32 %v403_v43, %v389_v48  ;;  %v2453_v36 = vmul.f32 %v427_v47, %v389_v48  ;;  %v755_v43 = vpop.permute.xlu0 %754 }
 0x107   : > { %3152 = sst [smem:[#allocation72_spill]] %s2289_s12 }
 0x108   : > { %3158 = sst [smem:[#allocation73_spill]] %s2299_s4 }
 0x109   : > { %s3160_s30 = sld [smem:[#allocation83_spill]]  ;;  %v748_v12 = vstv %s2311_s1 }
 0x10a   : > { %s3161_s28 = sld [smem:[#allocation84_spill]]  ;;  %v2403_v17 = vmul.f32 %v748_v12, %v2221_v19  ;;  %v558_v12 = vsel %vm557_vm10, %v554_v39, %v556_v8  ;;  %v559_v19 = vsel %vm557_vm10, %v556_v8, %v554_v39  ;;  %v563_v39 = vpop.permute.xlu1 %562 }
 0x10b   : > { %s3162_s22 = sld [smem:[#allocation85_spill]]  ;;  %v751_v29 = vstv %s2319_s19  ;;  %v568_v38 = vcombine.low %v559_v19, %v558_v12  ;;  %v564_v44 = vsel %vm557_vm10, %v561_v3, %v563_v39 }
 0x10c   : > { %3159 = sst [smem:[#allocation77_spill]] %s2329_s29  ;;  %3173 = vst [vmem:[#allocation91_spill] sm:$0xff] %v2403_v17  ;;  %v2406_v24 = vmul.f32 %v751_v29, %v2230_v23  ;;  %v345_v23 = vsel %vm343_vm4, %v340_v5, %v2291_v30  ;;  %v475_v29 = vrot.slane %v468_v11, %v2132_v41  ;;  %v565_v5 = vsel %vm557_vm10, %v563_v39, %v561_v3  ;;  %vm282_vm10 = vmand %vm280_vm5, %vm281_vm6 }
 0x10d   : > { %s2337_s18 = sld [smem:[#allocation2 + $0x60]]  ;;  %v354_v8 = vcombine.low %v345_v23, %v344_v10  ;;  %v496_v11 = vsel %vm2416_vm15, %v494_v37, 0.0  ;;  %v575_v12 = vrot.slane %v568_v38, %v2132_v41  ;;  %v587_v10 = vcombine.low %v565_v5, %v564_v44 }
 0x10e   : > { %s3164_s24 = sld [smem:[#allocation60_spill]]  ;;  %3174 = vst [vmem:[#allocation92_spill] sm:$0xff] %v2406_v24  ;;  %v396_v23 = vmul.f32 %v395_v42, %v389_v48  ;;  %v412_v3 = vmul.f32 %v411_v45, %v389_v48  ;;  %v420_v39 = vmul.f32 %v419_v46, %v389_v48  ;;  %v2457_v37 = vmul.f32 %v435_v49, %v389_v48  ;;  %v757_v44 = vpop.permute.xlu1 %756 }
 0x10f   : > { %s2345_s2 = sld [smem:[#allocation2 + $0x22]]  ;;  %v361_v19 = vrot.slane %v354_v8, %v2132_v41  ;;  %v2461_v38 = vmul.f32 %v443_v50, %v389_v48  ;;  %v477_v42 = vsel %vm2416_vm15, %v475_v29, 0.0  ;;  %v2467_v45 = vmul.f32 %v502_v51, %v496_v11 }
 0x110   : > { %s2350_s11 = sld [smem:[#allocation2 + $0x53]]  ;;  %v2471_v46 = vmul.f32 %v510_v53, %v496_v11  ;;  %v582_v47 = vrot.slane %v575_v12, %v2132_v41  ;;  %v2477_v50 = vmul.f32 %v518_v54, %v496_v11  ;;  %v527_v13 = vmul.f32 %v526_v55, %v496_v11 }
 0x111   : > { %s2364_s23 = sld [smem:[#allocation2 + $0x29]]  ;;  %v368_v49 = vrot.slane %v361_v19, %v2132_v41  ;;  %v2483_v48 = vmul.f32 %v534_v57, %v496_v11  ;;  %v594_v53 = vrot.slane %v587_v10, %v2132_v41  ;;  %v2499_v54 = vmul.f32 %v542_v58, %v496_v11 }
 0x112   : > { %s2372_s21 = sld [smem:[#allocation2 + $0x5a]]  ;;  %v2503_v55 = vmul.f32 %v550_v59, %v496_v11  ;;  %v500_v57 = vmul.f32 %v499_v60, %v477_v42  ;;  %v508_v62 = vmul.f32 %v507_v61, %v477_v42  ;;  %v2511_v29 = vmul.f32 %v515_v63, %v477_v42  ;;  %v764_v59 = vpop.permute.xlu1 %763  ;;  %v762_v11 = vpop.permute.xlu0 %761 }
 0x113   : > { %3163 = sst [smem:[#allocation83_spill]] %s2337_s18  ;;  %v370_v8 = vsel %vm2395_vm13, %v368_v49, 0.0  ;;  %v759_v5 = vsel %vm758_vm14, %v755_v43, %v757_v44  ;;  %v760_v58 = vsel %vm758_vm14, %v757_v44, %v755_v43  ;;  %v584_v60 = vsel %vm2489_vm0, %v582_v47, 0.0 }
 0x114   : > { %s3201_s4 = sld [smem:[#allocation44_spill]]  ;;  %3202 = vst [vmem:[#allocation93_spill] sm:$0xff] %v2503_v55  ;;  %v393_v61 = vmul.f32 %v392_v14, %v370_v8  ;;  %v401_v63 = vmul.f32 %v400_v16, %v370_v8  ;;  %v417_v22 = vmul.f32 %v416_v18, %v370_v8  ;;  %v524_v12 = vmul.f32 %v523_v0, %v477_v42 }
 0x115   : > { %3165 = sst [smem:[#allocation84_spill]] %s2345_s2  ;;  %v2531_v19 = vmul.f32 %v531_v1, %v477_v42  ;;  %v601_v43 = vrot.slane %v594_v53, %v2132_v41  ;;  %vm972_vm4 = vcmp.lt.s32.totalorder %v2127_v40, 80  ;;  %v769_v47 = vcombine.low %v759_v5, %v760_v58 }
 0x116   : > { %3166 = sst [smem:[#allocation85_spill]] %s2350_s11  ;;  %v397_v18 = vadd.f32 %v396_v23, %v393_v61  ;;  %v421_v0 = vadd.f32 %v420_v39, %v417_v22  ;;  %v405_v53 = vadd.f32 %v404_v28, %v401_v63  ;;  %v864_v17 = vpop.permute.xlu1 %863  ;;  %v862_v20 = vpop.permute.xlu0 %861  ;;  %vm1128_vm13 = vcmp.lt.s32.totalorder %v2127_v40, 2 }
 0x117   : > { %s3203_s29 = sld [smem:[#allocation45_spill]]  ;;  %v2559_v5 = vsel %vm2489_vm0, %v601_v43, 0.0  ;;  %v776_v2 = vrot.slane %v769_v47, %v2132_v41  ;;  %v867_v15 = vsel %vm865_vm3, %v864_v17, %v862_v20  ;;  %vm1206_vm6 = vcmp.lt.s32.totalorder %v2127_v40, 127 }
 0x118   : > { %3169 = sst [smem:[#allocation60_spill]] %s2372_s21  ;;  %v525_v39 = vadd.f32 %v524_v12, %v421_v0  ;;  %v501_v12 = vadd.f32 %v500_v57, %v397_v18  ;;  %v509_v43 = vadd.f32 %v508_v62, %v405_v53 }
 0x119   : > { %s3204_s19 = sld [smem:[#allocation46_spill]] }
 0x11a   : > { %s3205_s1 = sld [smem:[#allocation47_spill]]  ;;  %v3209_v10 = vstv %s3201_s4  ;;  %v528_v0 = vadd.f32 %v527_v13, %v525_v39  ;;  %v783_v13 = vrot.slane %v776_v2, %v2132_v41 }
 0x11b   : > { %s3206_s21 = sld [smem:[#allocation55_spill]]  ;;  %v2535_v44 = vmul.f32 %v3209_v10, %v477_v42 }
 0x11c   : > { %s3207_s13 = sld [smem:[#allocation48_spill]]  ;;  %v2611_v2 = vsel %vm2589_vm7, %v783_v13, 0.0 }
 0x11d   : > { %s3208_s11 = sld [smem:[#allocation49_spill]]  ;;  %v3211_v14 = vstv %s3203_s29 }
 0x11e   : > { %s3210_s18 = sld [smem:[#allocation50_spill]]  ;;  %v2541_v16 = vmul.f32 %v3211_v14, %v477_v42 }
 0x11f   : > { %s3212_s2 = sld [smem:[#allocation51_spill]]  ;;  %v3216_v1 = vstv %s3204_s19 }
 0x120   : > { %s3213_s12 = sld [smem:[#allocation52_spill]]  ;;  %v607_v49 = vmul.f32 %v3216_v1, %v584_v60  ;;  %v3218_v10 = vstv %s3205_s1 }
 0x121   : > { %s3214_s8 = sld [smem:[#allocation57_spill]]  ;;  %v2547_v30 = vmul.f32 %v3218_v10, %v584_v60  ;;  %v3219_v4 = vstv %s3206_s21 }
 0x122   : > { %s3215_s14 = sld [smem:[#allocation58_spill]]  ;;  %v409_v24 = vmul.f32 %v3219_v4, %v370_v8  ;;  %v3220_v42 = vstv %s3207_s13 }
 0x123   : > { %s3217_s7 = sld [smem:[#allocation59_spill]]  ;;  %v2553_v14 = vmul.f32 %v3220_v42, %v584_v60  ;;  %v3221_v23 = vstv %s3208_s11 }
 0x124   : > { %v631_v61 = vmul.f32 %v3221_v23, %v584_v60  ;;  %v3222_v58 = vstv %s3210_s18  ;;  %v413_v51 = vadd.f32 %v412_v3, %v409_v24  ;;  %v766_v24 = vsel %vm758_vm14, %v764_v59, %v762_v11  ;;  %s3231_s9 = sld [smem:[#allocation69_spill]] }
 0x125   : > { %v2563_v22 = vmul.f32 %v3222_v58, %v584_v60  ;;  %v3223_v1 = vstv %s3212_s2  ;;  %v634_v58 = vmul.f32 %v3228_v25, %v2559_v5  ;;  %v765_v25 = vsel %vm758_vm14, %v762_v11, %v764_v59  ;;  %s3233_s4 = sld [smem:[#allocation61_spill]] }
 0x126   : > { %v2567_v28 = vmul.f32 %v3223_v1, %v584_v60  ;;  %v3224_v4 = vstv %s3213_s12  ;;  %v869_v1 = vpop.permute.xlu0 %868  ;;  %v866_v3 = vsel %vm865_vm3, %v862_v20, %v864_v17  ;;  %v788_v57 = vcombine.low %v765_v25, %v766_v24  ;;  %s3237_s29 = sld [smem:[#allocation64_spill]] }
 0x127   : > { %v2571_v63 = vmul.f32 %v3224_v4, %v584_v60  ;;  %v3225_v10 = vstv %s3214_s8  ;;  %v871_v60 = vpop.permute.xlu1 %870  ;;  %v632_v4 = vadd.f32 %v631_v61, %v528_v0  ;;  %v876_v18 = vcombine.low %v866_v3, %v867_v15  ;;  %s3238_s19 = sld [smem:[#allocation65_spill]] }
 0x128   : > { %v425_v55 = vmul.f32 %v3225_v10, %v370_v8  ;;  %v3226_v42 = vstv %s3215_s14  ;;  %v872_v62 = vsel %vm865_vm3, %v869_v1, %v871_v60  ;;  %v873_v59 = vsel %vm865_vm3, %v871_v60, %v869_v1  ;;  %s3243_s1 = sld [smem:[#allocation74_spill]] }
 0x129   : > { %v433_v7 = vmul.f32 %v3226_v42, %v370_v8  ;;  %v3227_v21 = vstv %s3217_s7  ;;  %v504_v11 = vadd.f32 %v2467_v45, %v501_v12  ;;  %v795_v17 = vrot.slane %v788_v57, %v2132_v41  ;;  %s3245_s21 = sld [smem:[#allocation66_spill]] }
 0x12a   : > { %v441_v23 = vmul.f32 %v3227_v21, %v370_v8  ;;  %v635_v8 = vadd.f32 %v634_v58, %v632_v4  ;;  %v895_v20 = vcombine.low %v872_v62, %v873_v59  ;;  %v969_v53 = vpop.permute.xlu0 %968  ;;  %v512_v61 = vadd.f32 %v2471_v46, %v509_v43  ;;  %s3246_s13 = sld [smem:[#allocation78_spill]] }
 0x12b   : > { %v971_v47 = vpop.permute.xlu1 %970  ;;  %v429_v39 = vadd.f32 %v2453_v36, %v425_v55  ;;  %v3232_v10 = vstv %s3130_s6  ;;  %v883_v12 = vrot.slane %v876_v18, %v2132_v41  ;;  %v608_v1 = vadd.f32 %v607_v49, %v504_v11  ;;  %s3236_s6 = sld [smem:[#allocation62_spill]] }
 0x12c   : > { %v610_v42 = vmul.f32 %v3232_v10, %v2559_v5  ;;  %v726_v0 = vadd.f32 %v2259_v56, %v635_v8  ;;  %v973_v45 = vsel %vm972_vm4, %v969_v53, %v971_v47  ;;  %v902_v58 = vrot.slane %v895_v20, %v2132_v41  ;;  %s3248_s11 = sld [smem:[#allocation75_spill]] }
 0x12d   : > { %v974_v60 = vsel %vm972_vm4, %v971_v47, %v969_v53  ;;  %v437_v46 = vadd.f32 %v2457_v37, %v433_v7  ;;  %v3234_v55 = vstv %s3231_s9  ;;  %v445_v4 = vadd.f32 %v2461_v38, %v441_v23  ;;  %s3252_s18 = sld [smem:[#allocation80_spill]] }
 0x12e   : > { %v729_v36 = vadd.f32 %v2263_v6, %v726_v0  ;;  %v832_v43 = vmul.f32 %v3234_v55, %v2611_v2  ;;  %v983_v56 = vcombine.low %v973_v45, %v974_v60  ;;  %v802_v25 = vrot.slane %v795_v17, %v2132_v41  ;;  %v976_v3 = vpop.permute.xlu0 %975  ;;  %s3253_s2 = sld [smem:[#allocation81_spill]] }
 0x12f   : > { %v978_v24 = vpop.permute.xlu1 %977  ;;  %v611_v13 = vadd.f32 %v610_v42, %v608_v1  ;;  %v616_v57 = vadd.f32 %v2547_v30, %v512_v61  ;;  %v517_v15 = vadd.f32 %v2511_v29, %v413_v51  ;;  %v3235_v49 = vstv %s3233_s4  ;;  %s3290_s12 = sld [smem:[#allocation77_spill]] }
 0x130   : > { %v618_v7 = vmul.f32 %v3235_v49, %v2559_v5  ;;  %v2638_v6 = vadd.f32 %v832_v43, %v729_v36  ;;  %v990_v37 = vrot.slane %v983_v56, %v2132_v41  ;;  %v890_v62 = vrot.slane %v883_v12, %v2132_v41  ;;  %s3291_s8 = sld [smem:[#allocation84_spill]] }
 0x131   : > { %v909_v38 = vrot.slane %v902_v58, %v2132_v41  ;;  %v979_v23 = vsel %vm972_vm4, %v976_v3, %v978_v24  ;;  %v980_v30 = vsel %vm972_vm4, %v978_v24, %v976_v3  ;;  %v533_v29 = vadd.f32 %v2531_v19, %v429_v39  ;;  %s3293_s14 = sld [smem:[#allocation71_spill]] }
 0x132   : > { %v541_v51 = vadd.f32 %v2535_v44, %v437_v46  ;;  %v1002_v8 = vcombine.low %v979_v23, %v980_v30  ;;  %v702_v18 = vadd.f32 %v2270_v34, %v611_v13  ;;  %v2655_v59 = vadd.f32 %v2541_v16, %v445_v4  ;;  %s2807_s7 = sld [smem:[#allocation2 + $0x5e]] }
 0x133   : > { %v2659_v11 = vsel %vm2589_vm7, %v802_v25, 0.0  ;;  %v997_v19 = vrot.slane %v990_v37, %v2132_v41  ;;  %v619_v44 = vadd.f32 %v618_v7, %v616_v57  ;;  %v3239_v17 = vstv %s3236_s6  ;;  %s3296_s9 = sld [smem:[#allocation83_spill]] }
 0x134   : > { %v626_v20 = vmul.f32 %v3239_v17, %v2559_v5  ;;  %v1009_v34 = vrot.slane %v1002_v8, %v2132_v41  ;;  %v705_v16 = vadd.f32 %v2273_v33, %v702_v18  ;;  %v3242_v21 = vstv %s3145_s26  ;;  %s3250_s26 = sld [smem:[#allocation79_spill]] }
 0x135   : > { %v808_v47 = vmul.f32 %v3242_v21, %v2611_v2  ;;  %v3244_v53 = vstv %s3237_s29  ;;  %v2681_v39 = vsel %vm282_vm10, %v890_v62, 0.0  ;;  %v2683_v35 = vsel %vm282_vm10, %v909_v38, 0.0  ;;  %s3299_s4 = sld [smem:[#allocation85_spill]]  ;;  %s1790_s29 = smov 1  }
 0x136   : > { %v642_v61 = vmul.f32 %v3244_v53, %v2559_v5  ;;  %v710_v10 = vadd.f32 %v2306_v32, %v619_v44  ;;  %v1016_v42 = vrot.slane %v1009_v34, %v2132_v41  ;;  %v3247_v33 = vstv %s2095_s25  ;;  %s3256_s25 = sld [smem:[#allocation76_spill]] }
 0x137   : > { %v809_v0 = vadd.f32 %v808_v47, %v705_v16  ;;  %v811_v45 = vmul.f32 %v3247_v33, %v2659_v11  ;;  %v520_v12 = vadd.f32 %v2477_v50, %v517_v15  ;;  %v3249_v58 = vstv %s3238_s19  ;;  %s3305_s6 = sld [smem:[#allocation60_spill]]  ;;  %s1792_s19 = smov 126  }
 0x138   : > { %v650_v60 = vmul.f32 %v3249_v58, %v2559_v5  ;;  %v2696_v1 = vsel %vm2669_vm11, %v997_v19, 0.0  ;;  %v713_v32 = vadd.f32 %v2309_v52, %v710_v10  ;;  %v3251_v46 = vstv %s3151_s3  ;;  %s3263_s3 = sld [smem:[#allocation82_spill]] }
 0x139   : > { %v816_v36 = vmul.f32 %v3251_v46, %v2611_v2  ;;  %v812_v55 = vadd.f32 %v811_v45, %v809_v0  ;;  %v3254_v43 = vstv %s3146_s20  ;;  %v3255_v50 = vstv %s3243_s1  ;;  %s2739_s20 = sld [smem:[#allocation2 + $0x30]]  ;;  %s1793_s1 = smov 125  }
 0x13a   : > { %v915_v56 = vmul.f32 %v3254_v43, %v2681_v39  ;;  %v918_v4 = vmul.f32 %v3255_v50, %v2683_v35  ;;  %v624_v25 = vadd.f32 %v2553_v14, %v520_v12  ;;  %v3257_v24 = vstv %s3245_s21 }
 0x13b   : > { %v2712_v3 = vmul.f32 %v3257_v24, %v2559_v5  ;;  %v2716_v52 = vsel %vm2669_vm11, %v1016_v42, 0.0  ;;  %v817_v13 = vadd.f32 %v816_v36, %v713_v32  ;;  %v3258_v57 = vstv %s3246_s13 }
 0x13c   : > { %v819_v15 = vmul.f32 %v3258_v57, %v2659_v11  ;;  %v916_v49 = vadd.f32 %v915_v56, %v812_v55  ;;  %v3259_v7 = vstv %s3248_s11  ;;  %v627_v62 = vadd.f32 %v626_v20, %v624_v25  ;;  %v3273_v25 = vld [vmem:[#allocation86_spill] sm:$0xff]  ;;  %s3310_s11 = sld [smem:[#allocation96_spill]] }
 0x13d   : > { %v1022_v37 = vmul.f32 %v3259_v7, %v2696_v1  ;;  %v536_v14 = vadd.f32 %v2483_v48, %v533_v29  ;;  %v3260_v38 = vstv %s3250_s26  ;;  %v3261_v30 = vstv %s3252_s18  ;;  %s3311_s26 = sld [smem:[#allocation18_spill]] }
 0x13e   : > { %v820_v5 = vadd.f32 %v819_v15, %v817_v13  ;;  %v923_v23 = vmul.f32 %v3260_v38, %v2681_v39  ;;  %v926_v8 = vmul.f32 %v3261_v30, %v2683_v35  ;;  %v3262_v18 = vstv %s3253_s2  ;;  %v3274_v13 = vld [vmem:[#allocation87_spill] sm:$0xff]  ;;  %v3278_v38 = vld [vmem:[#allocation93_spill] sm:$0xff]  ;;  %s3312_s18 = sld [smem:[#allocation23_spill]] }
 0x13f   : > { %v1030_v19 = vmul.f32 %v3262_v18, %v2696_v1  ;;  %v919_v44 = vadd.f32 %v918_v4, %v916_v49  ;;  %v3264_v17 = vstv %s3256_s25  ;;  %v718_v20 = vadd.f32 %v2324_v26, %v627_v62  ;;  %s3313_s2 = sld [smem:[#allocation24_spill]] }
 0x140   : > { %v1025_v27 = vmul.f32 %v3264_v17, %v2716_v52  ;;  %v640_v48 = vadd.f32 %v2563_v22, %v536_v14  ;;  %v924_v29 = vadd.f32 %v923_v23, %v820_v5  ;;  %v3265_v34 = vstv %s2139_s27  ;;  %s2765_s27 = sld [smem:[#allocation2 + $0x57]]  ;;  %v3277_v14 = vld [vmem:[#allocation89_spill] sm:$0xff] }
 0x141   : > { %v824_v16 = vmul.f32 %v3265_v34, %v2611_v2  ;;  %v3266_v21 = vstv %s2147_s15  ;;  %v544_v53 = vadd.f32 %v2499_v54, %v541_v51  ;;  %v1023_v10 = vadd.f32 %v1022_v37, %v919_v44  ;;  %s2759_s15 = sld [smem:[#allocation2 + $0x61]] }
 0x142   : > { %v827_v47 = vmul.f32 %v3266_v21, %v2659_v11  ;;  %v721_v42 = vadd.f32 %v2327_v31, %v718_v20  ;;  %v3267_v26 = vstv %s2156_s10  ;;  %v643_v0 = vadd.f32 %v642_v61, %v640_v48  ;;  %s3279_s10 = sld [smem:[#allocation63_spill]] }
 0x143   : > { %v931_v22 = vmul.f32 %v3267_v26, %v2681_v39  ;;  %v927_v33 = vadd.f32 %v926_v8, %v924_v29  ;;  %v3268_v45 = vstv %s3263_s3  ;;  %v3269_v58 = vstv %s3160_s30  ;;  %s3285_s30 = sld [smem:[#allocation72_spill]]  ;;  %s1552_s3 = sshll.u32 %s3311_s26, 7 }
 0x144   : > { %v1033_v12 = vmul.f32 %v3268_v45, %v2716_v52  ;;  %v934_v32 = vmul.f32 %v3269_v58, %v2683_v35  ;;  %v648_v46 = vadd.f32 %v2567_v28, %v544_v53  ;;  %v1026_v54 = vadd.f32 %v1025_v27, %v1023_v10  ;;  %v3282_v27 = vld [vmem:[#allocation90_spill] sm:$0xff]  ;;  %s3314_s25 = sld [smem:[#allocation22_spill]] }
 0x145   : > { %v825_v51 = vadd.f32 %v824_v16, %v721_v42  ;;  %v3270_v31 = vstv %s3161_s28  ;;  %v734_v55 = vadd.f32 %v2354_v9, %v643_v0  ;;  %v1031_v61 = vadd.f32 %v1030_v19, %v927_v33  ;;  %v3275_v9 = vld [vmem:[#allocation88_spill] sm:$0xff]  ;;  %s3284_s28 = sld [smem:[#allocation67_spill]] }
 0x146   : > { %v1038_v36 = vmul.f32 %v3270_v31, %v2696_v1  ;;  %v3271_v43 = vstv %s3162_s22  ;;  %v3272_v50 = vstv %s2205_s16  ;;  %v651_v4 = vadd.f32 %v650_v60, %v648_v46  ;;  %s1788_s16 = smov 3   ;;  %s1789_s22 = smov 2  }
 0x147   : > { %v1041_v56 = vmul.f32 %v3271_v43, %v2716_v52  ;;  %v840_v28 = vmul.f32 %v3272_v50, %v2611_v2  ;;  %v1083_v24 = vrot.slane %v1026_v54, %v3273_v25  ;;  %v1079_v57 = vrot.slane %v1026_v54, %v3274_v13 }
 0x148   : > { %v828_v15 = vadd.f32 %v827_v47, %v825_v51  ;;  %v737_v49 = vadd.f32 %v3275_v9, %v734_v55  ;;  %v1034_v7 = vadd.f32 %v1033_v12, %v1031_v61  ;;  %v3276_v37 = vstv %s2214_s5  ;;  %s3286_s5 = sld [smem:[#allocation73_spill]]  ;;  %v3297_v51 = vld [vmem:[#allocation91_spill] sm:$0xff] }
 0x149   : > { %v843_v62 = vmul.f32 %v3276_v37, %v2659_v11  ;;  %v742_v5 = vadd.f32 %v3277_v14, %v651_v4  ;;  %v552_v23 = vadd.f32 %v3278_v38, %v2655_v59  ;;  %1088 = vrot.lane.b32.xlu1 %v1083_v24, %s1788_s16  ;;  %1086 = vrot.lane.b32.xlu0 %v1079_v57, %s1788_s16  ;;  %v3280_v8 = vstv %s3164_s24  ;;  %s2796_s24 = sld [smem:[#allocation2 + $0x2d]] }
 0x14a   : > { %v932_v60 = vadd.f32 %v931_v22, %v828_v15  ;;  %v841_v30 = vadd.f32 %v840_v28, %v737_v49  ;;  %v947_v18 = vmul.f32 %v3280_v8, %v2681_v39  ;;  %v1069_v19 = vstv %s2739_s20  ;;  %v3302_v15 = vld [vmem:[#allocation92_spill] sm:$0xff]  ;;  %s3315_s20 = sshll.u32 %s3312_s18, 3  ;;  %p3317_p3 = scmp.ne.s32.totalorder %s3314_s25, 0 }
 0x14b   : > { %v3281_v44 = vstv %s2232_s0  ;;  %v745_v20 = vadd.f32 %v3282_v27, %v742_v5  ;;  %v3283_v48 = vstv %s2275_s17  ;;  %v656_v59 = vadd.f32 %v2571_v63, %v552_v23  ;;  %s3288_s0 = sld [smem:[#allocation70_spill]] }
 0x14c   : > { %v950_v17 = vmul.f32 %v3281_v44, %v2683_v35  ;;  %v848_v29 = vmul.f32 %v3283_v48, %v2611_v2  ;;  %v1121_v34 = vrot.slane %v1034_v7, %v3273_v25  ;;  %v1117_v16 = vrot.slane %v1034_v7, %v3274_v13  ;;  %s3289_s17 = sld [smem:[#allocation68_spill]] }
 0x14d   : > { %v935_v21 = vadd.f32 %v934_v32, %v932_v60  ;;  %v844_v47 = vadd.f32 %v843_v62, %v841_v30  ;;  %v3287_v10 = vstv %s3279_s10  ;;  %v659_v26 = vadd.f32 %v2712_v3, %v656_v59 }
 0x14e   : > { %v849_v53 = vadd.f32 %v848_v29, %v745_v20  ;;  %v851_v42 = vmul.f32 %v3287_v10, %v2659_v11  ;;  %v1072_v22 = vstv %s2759_s15  ;;  %1126 = vrot.lane.b32.xlu1 %v1121_v34, %s1789_s22  ;;  %1124 = vrot.lane.b32.xlu0 %v1117_v16, %s1789_s22  ;;  %v3292_v33 = vstv %s3284_s28  ;;  %s238_s15 = scalar_lea.vmem [#allocation9], %s3315_s20  ;;  %s3316_s28 = sld [smem:[#allocation98_spill]] }
 0x14f   : > { %v1039_v63 = vadd.f32 %v1038_v36, %v935_v21  ;;  %v948_v0 = vadd.f32 %v947_v18, %v844_v47  ;;  %v1054_v45 = vmul.f32 %v3292_v33, %v2696_v1  ;;  %v941_v12 = vstv %s2765_s27  ;;  %s1341_s27 = sshll.u32 %s238_s15, 4  ;;  %s1342_s27 = int_to_ptr.vmem [resolvable:$true] %s1341_s27 }
 0x150   : > { %v852_v58 = vadd.f32 %v851_v42, %v849_v53  ;;  %v3294_v32 = vstv %s3285_s30  ;;  %v3295_v46 = vstv %s3286_s5  ;;  %v750_v31 = vadd.f32 %v3297_v51, %v659_v26  ;;  %v240_v51 = vld [vmem:[%s3310_s11] sm:$0x3]  ;;  %s1327_s5 = scalar_lea.sflag [#allocation4], %s3312_s18 }
 0x151   : > { %v955_v3 = vmul.f32 %v3294_v32, %v2681_v39  ;;  %v958_v54 = vmul.f32 %v3295_v46, %v2683_v35  ;;  %v3298_v36 = vstv %s3288_s0  ;;  %v1042_v61 = vadd.f32 %v1041_v56, %v1039_v63  ;;  %s1794_s0 = smov [#allocation9]  }
 0x152   : > { %v835_v55 = vmul.f32 %v3298_v36, %v2659_v11  ;;  %v951_v43 = vadd.f32 %v950_v17, %v948_v0  ;;  %v3300_v50 = vstv %s3289_s17  ;;  %v3301_v24 = vstv %s3290_s12  ;;  %s1708_s17 = sshll.u32 %s1794_s0, 4  ;;  %s1709_s17 = int_to_ptr.vmem [resolvable:$false] %s1708_s17 }
 0x153   : > { %v1057_v28 = vmul.f32 %v3300_v50, %v2716_v52  ;;  %v956_v4 = vadd.f32 %v955_v3, %v852_v58  ;;  %v1062_v57 = vmul.f32 %v3301_v24, %v2696_v1  ;;  %v753_v9 = vadd.f32 %v3302_v15, %v750_v31  ;;  %s1710_s22 = scalar_lea.vmem %s1709_s17, 256  ;;  %p1711_p13 = scmp.lt.s32.totalorder %s1342_s27, %s1709_s17 }
 0x154   : > { %v3303_v49 = vstv %s3291_s8  ;;  %v3304_v37 = vstv %s3293_s14  ;;  %v1159_v56 = vrot.slane %v1042_v61, %v3273_v25  ;;  %v1155_v14 = vrot.slane %v1042_v61, %v3274_v13  ;;  %s1339_s30 = scalar_lea.hbm %s3316_s28, %s1552_s3 }
 0x155   : > { %v856_v7 = vmul.f32 %v3303_v49, %v2611_v2  ;;  %v939_v62 = vmul.f32 %v3304_v37, %v2681_v39  ;;  %v1055_v5 = vadd.f32 %v1054_v45, %v951_v43  ;;  %v959_v38 = vadd.f32 %v958_v54, %v956_v4 }
 0x156   : > { %v3306_v23 = vstv %s3296_s9  ;;  %v3307_v8 = vstv %s3299_s4  ;;  %1164 = vrot.lane.b32.xlu1 %v1159_v56, %s1790_s29  ;;  %1162 = vrot.lane.b32.xlu0 %v1155_v14, %s1790_s29  ;;  %v836_v27 = vadd.f32 %v835_v55, %v2638_v6  ;;  %v942_v16 = vmul.f32 %v941_v12, %v2683_v35 }
 0x157   : > { %v1065_v60 = vmul.f32 %v3306_v23, %v2716_v52  ;;  %v857_v30 = vadd.f32 %v856_v7, %v753_v9  ;;  %v859_v18 = vmul.f32 %v3307_v8, %v2659_v11  ;;  %v1058_v2 = vadd.f32 %v1057_v28, %v1055_v5 }
 0x158   : > { %v3308_v44 = vstv %s2364_s23  ;;  %v1045_v20 = vstv %s2796_s24  ;;  %v1063_v48 = vadd.f32 %v1062_v57, %v959_v38  ;;  %v3309_v59 = vstv %s3305_s6  ;;  %s1791_s23 = smov 127   ;;  %s1704_s24 = scalar_lea.vmem %s1342_s27, 128 }
 0x159   : > { %v963_v17 = vmul.f32 %v3308_v44, %v2681_v39  ;;  %v860_v29 = vadd.f32 %v859_v18, %v857_v30  ;;  %v966_v34 = vmul.f32 %v3309_v59, %v2683_v35  ;;  %v1199_v21 = vrot.slane %v1058_v2, %v3273_v25  ;;  %p1705_p8 = scmp.ne.s32.totalorder %s1342_s27, %s1704_s24  ;;  %p1712_p0 = scmp.lt.s32.totalorder %s1710_s22, %s1704_s24 }
 0x15a   : > { %v1195_v11 = vrot.slane %v1058_v2, %v3274_v13  ;;  %v1070_v47 = vmul.f32 %v1069_v19, %v2696_v1  ;;  %v1048_v53 = vstv %s2807_s7  ;;  %v1066_v10 = vadd.f32 %v1065_v60, %v1063_v48 }
 0x15b   : > { %v964_v42 = vadd.f32 %v963_v17, %v860_v29  ;;  %v940_v39 = vadd.f32 %v939_v62, %v836_v27  ;;  %v1046_v6 = vmul.f32 %v1045_v20, %v2696_v1  ;;  %1204 = vrot.lane.b32.xlu1 %v1199_v21, %s1791_s23  ;;  %v1073_v63 = vmul.f32 %v1072_v22, %v2716_v52  ;;  %p1706_p11 = pnand %p1705_p8, %p3317_p3  ;;  %p1713_p2 = por %p1712_p0, %p1711_p13 }
 0x15c   : > { %1202 = vrot.lane.b32.xlu0 %v1195_v11, %s1791_s23  ;;  %v1049_v35 = vmul.f32 %v1048_v53, %v2716_v52  ;;  %v1237_v33 = vrot.slane %v1066_v10, %v3273_v25  ;;  %v1233_v45 = vrot.slane %v1066_v10, %v3274_v13  ;;  %v253_v61 = vadd.s32 4294967294, %v240_v51 }
 0x15d   : > { %v967_v26 = vadd.f32 %v966_v34, %v964_v42  ;;  %v943_v0 = vadd.f32 %v942_v16, %v940_v39  ;;  %v245_v28 = vadd.s32 4294967293, %v240_v51  ;;  %v261_v57 = vadd.s32 4294967295, %v240_v51  ;;  %p1707_p1 = pneg %p1706_p11 }
 0x15e   : > { %vm1166_vm14 = vcmp.lt.s32.totalorder %v2127_v40, 1  ;;  %vm254_vm15 = vcmp.ge.s32.totalorder %v253_v61, 0  ;;  %vm255_vm0 = vcmp.lt.s32.totalorder %v253_v61, 16  ;;  %v275_v30 = vadd.s32 1, %v240_v51 }
 0x15f   : > { %v1071_v19 = vadd.f32 %v1070_v47, %v967_v26  ;;  %v1047_v12 = vadd.f32 %v1046_v6, %v943_v0  ;;  %1242 = vrot.lane.b32.xlu1 %v1237_v33, %s1792_s19  ;;  %vm246_vm1 = vcmp.ge.s32.totalorder %v245_v28, 0  ;;  %vm247_vm2 = vcmp.lt.s32.totalorder %v245_v28, 16  ;;  %vm256_vm3 = vmand %vm254_vm15, %vm255_vm0  ;;  %p1714_p5 = pnand %p1713_p2, %p1707_p1 }
 0x160   : > { %1240 = vrot.lane.b32.xlu0 %v1233_v45, %s1792_s19  ;;  %vm262_vm4 = vcmp.ge.s32.totalorder %v261_v57, 0  ;;  %vm263_vm5 = vcmp.lt.s32.totalorder %v261_v57, 16  ;;  %vm248_vm7 = vmand %vm246_vm1, %vm247_vm2  ;;  %vm268_vm10 = vcmp.ge.s32.totalorder %v240_v51, 0  ;;  %vm269_vm11 = vcmp.lt.s32.totalorder %v240_v51, 16 }
 0x161   : > { %v1074_v58 = vadd.f32 %v1073_v63, %v1071_v19  ;;  %v2858_v1 = vadd.f32 %v1049_v35, %v1047_v12  ;;  %vm264_vm8 = vmand %vm262_vm4, %vm263_vm5  ;;  %v283_v27 = vadd.s32 2, %v240_v51  ;;  %v291_v53 = vadd.s32 3, %v240_v51 }
 0x162   : > { %vm1282_vm1 = vcmp.lt.s32.totalorder %v2127_v40, 125 }
 0x163   : > { %v1275_v32 = vrot.slane %v1074_v58, %v3273_v25  ;;  %v1271_v3 = vrot.slane %v1074_v58, %v3274_v13  ;;  %vm284_vm15 = vcmp.ge.s32.totalorder %v283_v27, 0  ;;  %vm285_vm0 = vcmp.lt.s32.totalorder %v283_v27, 16 }
 0x164   : > { %vm292_vm4 = vcmp.ge.s32.totalorder %v291_v53, 0  ;;  %vm293_vm5 = vcmp.lt.s32.totalorder %v291_v53, 16 }
 0x165   : > { %1280 = vrot.lane.b32.xlu1 %v1275_v32, %s1793_s1  ;;  %1278 = vrot.lane.b32.xlu0 %v1271_v3, %s1793_s1 }
 0x1bb   : > { %v1089_v52 = vpop.permute.xlu1 %1088  ;;  %v1087_v22 = vpop.permute.xlu0 %1086 }
 0x1bc   : > { %v1091_v46 = vsel %vm1090_vm12, %v1087_v22, %v1089_v52  ;;  %v1092_v54 = vsel %vm1090_vm12, %v1089_v52, %v1087_v22  ;;  %vm276_vm12 = vcmp.ge.s32.totalorder %v275_v30, 0 }
 0x1bd   : > { %v1095_v55 = vcombine.low %v1092_v54, %v1091_v46 }
 0x1bf   : > { %v1102_v15 = vrot.slane %v1095_v55, %v2132_v41  ;;  %v1638_v55 = vld [vmem:[%s3313_s2] sm:$0xff] }
 0x1c0   : > { %v1127_v31 = vpop.permute.xlu1 %1126  ;;  %v1125_v36 = vpop.permute.xlu0 %1124 }
 0x1c1   : > { %v1129_v43 = vsel %vm1128_vm13, %v1125_v36, %v1127_v31  ;;  %v1130_v50 = vsel %vm1128_vm13, %v1127_v31, %v1125_v36  ;;  %v1109_v14 = vrot.slane %v1102_v15, %v2132_v41  ;;  %vm277_vm13 = vcmp.lt.s32.totalorder %v275_v30, 16 }
 0x1c2   : > { %v1133_v4 = vcombine.low %v1130_v50, %v1129_v43  ;;  %vm278_vm2 = vmand %vm276_vm12, %vm277_vm13 }
 0x1c3   : > { %v1111_v17 = vsel %vm248_vm7, %v1109_v14, 0.0 }
 0x1c4   : > { %v1140_v24 = vrot.slane %v1133_v4, %v2132_v41 }
 0x1c6   : > { %v1147_v7 = vrot.slane %v1140_v24, %v2132_v41 }
 0x1c8   : > { %v1165_v9 = vpop.permute.xlu1 %1164  ;;  %v1163_v49 = vpop.permute.xlu0 %1162  ;;  %v1149_v60 = vsel %vm256_vm3, %v1147_v7, 0.0  ;;  %vm286_vm3 = vmand %vm284_vm15, %vm285_vm0 }
 0x1c9   : > { %v1167_v37 = vsel %vm1166_vm14, %v1163_v49, %v1165_v9  ;;  %v1168_v62 = vsel %vm1166_vm14, %v1165_v9, %v1163_v49  ;;  %v1150_v20 = vadd.f32 %v1149_v60, %v1111_v17  ;;  %vm270_vm14 = vmand %vm268_vm10, %vm269_vm11 }
 0x1ca   : > { %v1171_v56 = vcombine.low %v1168_v62, %v1167_v37  ;;  %v1189_v39 = vsel %vm270_vm14, %v2858_v1, 0.0 }
 0x1cc   : > { %v1178_v5 = vrot.slane %v1171_v56, %v2132_v41 }
 0x1cd   : > { %v1205_v38 = vpop.permute.xlu1 %1204 }
 0x1ce   : > { %v1203_v23 = vpop.permute.xlu0 %1202  ;;  %v1185_v2 = vrot.slane %v1178_v5, %v2132_v41 }
 0x1cf   : > { %v1207_v8 = vsel %vm1206_vm6, %v1203_v23, %v1205_v38  ;;  %v1208_v18 = vsel %vm1206_vm6, %v1205_v38, %v1203_v23  ;;  %vm294_vm6 = vmand %vm292_vm4, %vm293_vm5 }
 0x1d0   : > { %v1211_v44 = vcombine.low %v1207_v8, %v1208_v18  ;;  %v1187_v48 = vsel %vm264_vm8, %v1185_v2, 0.0 }
 0x1d1   : > { %v1243_v59 = vpop.permute.xlu1 %1242  ;;  %v1188_v11 = vadd.f32 %v1187_v48, %v1150_v20 }
 0x1d2   : > { %v1218_v29 = vrot.slane %v1211_v44, %v2132_v41  ;;  %v1241_v34 = vpop.permute.xlu0 %1240 }
 0x1d3   : > { %v1245_v16 = vsel %vm1244_vm9, %v1241_v34, %v1243_v59  ;;  %v1246_v21 = vsel %vm1244_vm9, %v1243_v59, %v1241_v34  ;;  %v1190_v63 = vadd.f32 %v1189_v39, %v1188_v11 }
 0x1d4   : > { %v1249_v47 = vcombine.low %v1245_v16, %v1246_v21  ;;  %v1225_v10 = vrot.slane %v1218_v29, %v2132_v41 }
 0x1d6   : > { %v1256_v42 = vrot.slane %v1249_v47, %v2132_v41  ;;  %v1227_v45 = vsel %vm278_vm2, %v1225_v10, 0.0 }
 0x1d7   : > { %v1281_v6 = vpop.permute.xlu1 %1280  ;;  %v1279_v26 = vpop.permute.xlu0 %1278  ;;  %v1228_v58 = vadd.f32 %v1227_v45, %v1190_v63 }
 0x1d8   : > { %v1263_v0 = vrot.slane %v1256_v42, %v2132_v41  ;;  %v1283_v35 = vsel %vm1282_vm1, %v1279_v26, %v1281_v6  ;;  %v1284_v33 = vsel %vm1282_vm1, %v1281_v6, %v1279_v26 }
 0x1d9   : > { %v1287_v19 = vcombine.low %v1283_v35, %v1284_v33 }
 0x1da   : > { %v1265_v12 = vsel %vm286_vm3, %v1263_v0, 0.0 }
 0x1db   : > { %v1294_v40 = vrot.slane %v1287_v19, %v2132_v41  ;;  %v1266_v32 = vadd.f32 %v1265_v12, %v1228_v58 }
 0x1dd   : > { %v1301_v1 = vrot.slane %v1294_v40, %v2132_v41 }
 0x1df   : > { %v1303_v3 = vsel %vm294_vm6, %v1301_v1, 0.0 }
 0x1e0   : > { %v1304_v52 = vadd.f32 %v1303_v3, %v1266_v32 }
 0x1e2   : > { %v1545_v22 = vmul.f32 -1.442695, %v1304_v52 }
 0x1e4   : > { %1634 = vpow2.f32 %v1545_v22 }
 0x1f1   : > { %v1635_v46 = vpop.eup %1634 }
 0x1f2   : > { %v1308_v54 = vadd.f32 1.0, %v1635_v46 }
 0x1f4   : > { %1636 = vrcp.f32 %v1308_v54 }
 0x201   : > { %v1637_v51 = vpop.eup %1636 }
 0x202   : > { %v1315_v31 = vrot.slane %v1637_v51, %v3274_v13  ;;  %v1319_v36 = vrot.slane %v1637_v51, %v3273_v25 }
 0x204   : > { %v1320_v41 = vcombine.low %v1315_v31, %v1319_v36 }
 0x206   : > { %v1322_v61 = vmul.f32 %v1638_v55, %v1320_v41 }
 0x208   : > { %1325 = vst [vmem:[%s238_s15] sm:$0xff] %v1322_v61 }
 0x209   : > { %1717 = shalt.err (!%p1714_p5)
}
 0x20a   : > { %s1718_s12 = scalar_lea.hbm %s1339_s30, 128  ;;  %s1722_s7 = scalar_lea.hbm %s3316_s28, 256 }
 0x20b   : > { %p1719_p7 = scmp.ne.s32.totalorder %s1339_s30, %s1718_s12  ;;  %p1723_p12 = scmp.lt.s32.totalorder %s1339_s30, %s3316_s28 }
 0x20c   : > { %p1724_p9 = scmp.lt.s32.totalorder %s1722_s7, %s1718_s12 }
 0x20d   : > { %p1720_p10 = pnand %p1719_p7, %p3317_p3 }
 0x20e   : > { %p1725_p4 = por %p1724_p9, %p1723_p12 }
 0x20f   : > { %p1721_p6 = pneg %p1720_p10 }
 0x211   : > { %p1726_p8 = pnand %p1725_p4, %p1721_p6 }
 0x213   : > { %1729 = shalt.err (!%p1726_p8)
}
 0x214   : > { %1563 = dma.vmem_to_hbm [thread:$0]  (%p3317_p3), %s1342_s27, 128, %s1339_s30, %s1327_s5  }
 0x215 PF: > { %s3318_s6 = sld [smem:[#allocation14_spill]] }
 0x216   : > { %s3319_s29 = sld [smem:[#allocation19_spill]] }
 0x217   : > { %s3320_s23 = sld [smem:[#allocation17_spill]] }
 0x21b   : > { %s1353_s19 = sand.u32 1, %s3318_s6  }
 0x21c   : > { %p3321_p11 = scmp.ne.s32.totalorder %s3319_s29, 0  ;;  %s1354_s1 = scalar_lea.sflag [#allocation4], %s1353_s19 }
 0x21d   : > { %p3322_p1 = scmp.ge.s32.totalorder %s3320_s23, 2 }
 0x21f   : > { %p1577_p13 = pnand %p3322_p1, %p3321_p11 }
 0x221   : > { %p1578_p0 = pneg %p1577_p13 }
 0x223   : > { %1759 = dma.done.wait (%p1578_p0), %s1354_s1, 128  }
 0x224   : > { %1761 = vsyncadd (%p1578_p0), %s1354_s1, 4294967168  ;;  %s3323_s18 = sld [smem:[#allocation20_spill]] }
 0x225   : > { %s3324_s15 = sld [smem:[#allocation15_spill]] }
 0x226   : > { %s3325_s16 = sld [smem:[#allocation16_spill]] }
 0x227   : > { %s3326_s17 = sld [smem:[#allocation21_spill]] }
 0x22a   : > { %p19_p2 = scmp.ge.s32.totalorder %s3323_s18, 4  }
 0x22c   :  { %21 = sbr.rel (!%p19_p2) target bundleno = 13 (0xd), region = 93 }
 0x231   :  { %1359 = vsyncpa [#allocation3], 1 }
 0x232   :  { %1361 = vsyncpa [#allocation3 + $0x1], 1 }
 0x233   :  { %1362 = vsyncpa [#allocation8], 1 }
 0x234   :  { %1364 = vsyncpa [#allocation8 + $0x1], 1 }
 0x235   :  { %1365 = vsyncpa [#allocation4], 1 }
 0x236   :  { %1367 = vsyncpa [#allocation4 + $0x1], 1 }
 0x237   :  { %1368 = vsyncpa [#allocation5], 1 }
 0x238   :  { %1370 = vsyncpa [#allocation5 + $0x1], 1 }

</bundles_post_ra>
